<compile_context>
chip_gen: v7x
topology: tpu7x:2x2x1
jax: 0.10.0
libtpu: 0.0.40
codegen_flags: <defaults>
</compile_context>

<pallas_src>
import math
from functools import partial

import jax
import jax.numpy as jnp
from jax.experimental import pallas as pl
from jax.experimental.pallas import tpu as pltpu


def _round_up(x, m):
    return ((x + m - 1) // m) * m


def _pick_tile_rows(Ho, needed, target):
    """Largest TR <= target with TR | Ho and (needed | TR when needed > 0)."""
    step = max(needed, 1)
    best = None
    for tr in range(step, min(target, Ho) + 1, step):
        if Ho % tr == 0:
            best = tr
    if best is None:
        return Ho, False            # fallback: one whole-image tile, no halo
    return best, True


# -----------------------------------------------------------------------------
# Fused kernel.  Per grid step (one batch image, one TR-row output tile):
#   x_ref    : (1, P, rows, Ws, C)  bf16 phase-packed padded band (P = s*s)
#   halo_ref : (1, P, hb,   Ws, C)  bf16 next rows of the same array (halo)
#   dw_ref   : (K*K, C)  f32  depthwise weights
#   pw_ref   : (C, C)    bf16 pointwise weights with BN scale folded in
#   sh_ref   : (1, C)    f32  folded BN shift
#   o_ref    : (1, TR, Wo, C)  output tile (lane-dense: C on the lanes)
# -----------------------------------------------------------------------------
def _dwc_patch_embed_kernel(x_ref, halo_ref, dw_ref, pw_ref, sh_ref, o_ref,
                            *, K, s, TR, Wo, use_halo, tap_dtype):
    C = o_ref.shape[-1]
    Ws = x_ref.shape[3]
    dw = dw_ref[...]                                       # (K*K, C), loaded once

    row_cache = {}

    def rows_for(ph, oi):
        """(TR, Ws, C) band of packed rows [oi, oi+TR) for row-phase ph."""
        key = (ph, oi)
        if key not in row_cache:
            if use_halo:
                if oi == 0:
                    r = x_ref[0, ph, 0:TR]
                else:  # last oi rows spill into the halo view of the next tile
                    r = jnp.concatenate(
                        [x_ref[0, ph, oi:TR], halo_ref[0, ph, 0:oi]], axis=0)
            else:
                r = x_ref[0, ph, oi:oi + TR]
            row_cache[key] = r.astype(tap_dtype)
        return row_cache[key]

    # Depthwise accumulation on the VPU (statically unrolled taps).  Column
    # offsets are XLU rolls on the full-width band; acc starts from tap 0.
    acc = None
    for i in range(K):
        for j in range(K):
            ph = (i % s) * s + (j % s)          # phase (static)
            oi, oj = i // s, j // s             # packed row/col offset (static)
            rows = rows_for(ph, oi)
            tap = rows if oj == 0 else pltpu.roll(rows, shift=Ws - oj, axis=1)
            term = tap * dw[i * K + j].astype(tap_dtype)
            acc = term if acc is None else acc + term

    # Pointwise 1x1 conv on the MXU: bf16 operands, f32 accumulation.
    lhs = acc[:, :Wo, :].reshape(TR * Wo, C).astype(jnp.bfloat16)
    y = jnp.dot(lhs, pw_ref[...], preferred_element_type=jnp.float32)

    # Folded BN (scale already in pw columns) + Hardswish.
    y = y + sh_ref[...]
    y = y * jnp.clip(y + 3.0, 0.0, 6.0) * (1.0 / 6.0)
    o_ref[0] = y.astype(o_ref.dtype).reshape(TR, Wo, C)


def dwc_patch_embed(x_nhwc, params, *, stride=1, tile_rows=32,
                    out_dtype=jnp.bfloat16, tap_dtype=jnp.float32):
    """DWCPatchEmbed forward.  x_nhwc: [B, H, W, C] channels-last."""
    dw_w = params["dw_w"]          # (K, K, C)   depthwise (groups=C) weights
    pw_w = params["pw_w"]          # (C, C)      pointwise weights (cin, cout)
    scale = params["bn_scale"]     # (C,)        gamma / sqrt(var + eps)
    shift = params["bn_shift"]     # (C,)        beta - mean * scale

    B, H, W, C = x_nhwc.shape
    K = int(dw_w.shape[0])
    s = int(stride)
    p = (K - 1) // 2
    Ho = (H + 2 * p - K) // s + 1
    Wo = (W + 2 * p - K) // s + 1
    needed = (K - 1) // s                       # halo rows/cols in packed units

    # Packed (phase-major) padded extents.  Ws is rounded to a multiple of 8 so
    # in-kernel sublane rolls stay tile-aligned; the row axis needs no rounding.
    Hs = max(Ho + needed, -(-(H + p) // s))
    Ws = _round_up(max(Wo + needed, -(-(W + p) // s)), 8)

    # bf16 activations through HBM; single pad (fuses with the cast).
    xb = x_nhwc.astype(jnp.bfloat16)
    xp = jnp.pad(xb, ((0, 0), (p, Hs * s - p - H), (p, Ws * s - p - W), (0, 0)))
    if s == 1:
        x_pk = xp[:, None]                      # free unit dim, no repack pass
    else:
        # One phase-packing pass so strided taps become contiguous in-kernel.
        x_pk = (xp.reshape(B, Hs, s, Ws, s, C)
                  .transpose(0, 2, 4, 1, 3, 5)
                  .reshape(B, s * s, Hs, Ws, C))
    P = s * s

    # Output-row tiling with a halo view of the same array.
    TR, use_halo = _pick_tile_rows(Ho, needed, tile_rows)
    T = Ho // TR if use_halo else 1
    hb = max(needed, 1)
    halo_cap = Hs // hb - 1                     # keep the halo block in bounds
    main_rows = TR if use_halo else Hs

    # Fold the BN scale into the pointwise columns (f32), then cast to bf16.
    pw_eff = (pw_w * scale[None, :]).astype(jnp.bfloat16)
    dw_flat = dw_w.reshape(K * K, C).astype(jnp.float32)
    shift2d = shift.reshape(1, C).astype(jnp.float32)

    kernel = partial(_dwc_patch_embed_kernel, K=K, s=s, TR=TR, Wo=Wo,
                     use_halo=use_halo, tap_dtype=tap_dtype)

    # Note: if xprof still shows exposed input DMA at production sizes, add
    # pipeline_mode=pl.Buffered(3) on the first in_spec only.
    out = pl.pallas_call(
        kernel,
        out_shape=jax.ShapeDtypeStruct((B, Ho, Wo, C), out_dtype),
        grid=(B, T),
        in_specs=[
            pl.BlockSpec((1, P, main_rows, Ws, C),
                         lambda b, t: (b, 0, t, 0, 0)),
            pl.BlockSpec((1, P, hb, Ws, C),
                         lambda b, t: (b, 0,
                                       jnp.minimum((t + 1) * (TR // hb),
                                                   halo_cap), 0, 0)),
            pl.BlockSpec((K * K, C), lambda b, t: (0, 0)),
            pl.BlockSpec((C, C), lambda b, t: (0, 0)),
            pl.BlockSpec((1, C), lambda b, t: (0, 0)),
        ],
        out_specs=pl.BlockSpec((1, TR, Wo, C), lambda b, t: (b, t, 0, 0)),
        compiler_params=pltpu.CompilerParams(
            dimension_semantics=("parallel", "parallel")),
    )(x_pk, x_pk, dw_flat, pw_eff, shift2d)

    return out                                   # NHWC bf16


def dwc_patch_embed_nchw(x_nchw, params, *, stride=1, **kw):
    """PyTorch-layout adapter (adds one transpose each way at the boundary)."""
    out = dwc_patch_embed(jnp.transpose(x_nchw, (0, 2, 3, 1)), params,
                          stride=stride, **kw)
    return jnp.transpose(out, (0, 3, 1, 2))


# -----------------------------------------------------------------------------
# Parameter init matching DWConv2d_BN.__init__ (in_chans == embed_dim == C, as
# required by the depthwise conv with groups=out_ch).
# -----------------------------------------------------------------------------
def init_params(key, C, patch_size, bn_weight_init=1.0, eps=1e-5):
    k1, k2 = jax.random.split(key)
    K = patch_size
    dw_w = math.sqrt(2.0 / (K * K * C)) * jax.random.normal(k1, (K, K, C), jnp.float32)
    pw_w = math.sqrt(2.0 / C) * jax.random.normal(k2, (C, C), jnp.float32)
    # BatchNorm2d, inference mode with default running stats.
    gamma = jnp.full((C,), bn_weight_init, jnp.float32)
    beta = jnp.zeros((C,), jnp.float32)
    mean = jnp.zeros((C,), jnp.float32)
    var = jnp.ones((C,), jnp.float32)
    scale = gamma * jax.lax.rsqrt(var + eps)
    shift = beta - mean * scale
    return dict(dw_w=dw_w, pw_w=pw_w, bn_scale=scale, bn_shift=shift)


# -----------------------------------------------------------------------------
# Pure-JAX (XLA) reference for correctness checking (NHWC).
# -----------------------------------------------------------------------------
def _reference(x_nhwc, params, stride):
    x = x_nhwc.astype(jnp.float32)
    C = x.shape[-1]
    K = int(params["dw_w"].shape[0])
    p = (K - 1) // 2
    dw = params["dw_w"].reshape(K, K, 1, C)            # HWIO, depthwise
    y = jax.lax.conv_general_dilated(
        x, dw, (stride, stride), [(p, p), (p, p)],
        dimension_numbers=("NHWC", "HWIO", "NHWC"), feature_group_count=C)
    y = jnp.einsum("bhwc,cd->bhwd", y, params["pw_w"])
    y = y * params["bn_scale"] + params["bn_shift"]
    return y * jnp.clip(y + 3.0, 0.0, 6.0) / 6.0


# -----------------------------------------------------------------------------
if __name__ == "__main__":
    B, H, W, C = 2, 16, 16, 128        # in_chans == embed_dim (depthwise conv)
    patch_size = 3

    key = jax.random.PRNGKey(0)
    kx, kp = jax.random.split(key)
    x = jax.random.normal(kx, (B, H, W, C), dtype=jnp.float32)
    params = init_params(kp, C, patch_size)

    def check(out, ref):
        assert out.shape == ref.shape, (out.shape, ref.shape)
        err = float(jnp.max(jnp.abs(out.astype(jnp.float32) - ref)))
        assert err < 2e-2, err

    # stride = 1 (module default), forced row tiling -> T=2 halo path
    out = dwc_patch_embed(x, params, stride=1, tile_rows=8)
    jax.block_until_ready(out)
    assert out.shape == (B, H, W, C)
    check(out, _reference(x, params, 1))

    # strided (downsampling) path used between stages: phase-packed input
    out2 = dwc_patch_embed(x, params, stride=2)
    jax.block_until_ready(out2)
    assert out2.shape == (B, H // 2, W // 2, C)
    check(out2, _reference(x, params, 2))

    # odd spatial size -> whole-image fallback path (no halo tiling)
    x3 = jax.random.normal(jax.random.PRNGKey(1), (B, 7, 7, C), jnp.float32)
    out3 = dwc_patch_embed(x3, params, stride=1)
    jax.block_until_ready(out3)
    check(out3, _reference(x3, params, 1))

    print("KERNEL_OK")
</pallas_src>

<mosaic_0001>
module attributes {stable_mosaic.version = 11 : i64} {
  func.func @_dwc_patch_embed_kernel(%arg0: i32, %arg1: i32, %arg2: memref<1x1x8x24x128xbf16, #tpu.memory_space<vmem>>, %arg3: memref<1x1x2x24x128xbf16, #tpu.memory_space<vmem>>, %arg4: memref<9x128xf32, #tpu.memory_space<vmem>>, %arg5: memref<128x128xbf16, #tpu.memory_space<vmem>>, %arg6: memref<1x128xf32, #tpu.memory_space<vmem>>, %arg7: memref<1x8x16x128xbf16, #tpu.memory_space<vmem>>) attributes {dimension_semantics = [#tpu.dimension_semantics<parallel>, #tpu.dimension_semantics<parallel>], iteration_bounds = array<i64: 2, 2>, scalar_prefetch = 0 : i64, scratch_operands = 0 : i64, tpu.core_type = #tpu.core_type<tc>, window_params = [{transform_indices = @transform_0, window_bounds = array<i64: 1, 1, 8, 24, 128>}, {transform_indices = @transform_1, window_bounds = array<i64: 1, 1, 2, 24, 128>}, {pipeline_mode = #tpu.pipeline_mode<synchronous>, transform_indices = @transform_2, window_bounds = array<i64: 9, 128>}, {pipeline_mode = #tpu.pipeline_mode<synchronous>, transform_indices = @transform_3, window_bounds = array<i64: 128, 128>}, {pipeline_mode = #tpu.pipeline_mode<synchronous>, transform_indices = @transform_4, window_bounds = array<i64: 1, 128>}, {transform_indices = @transform_5, window_bounds = array<i64: 1, 8, 16, 128>}]} {
    %c0 = arith.constant 0 : index
    %c0_0 = arith.constant 0 : index
    %0 = vector.load %arg4[%c0, %c0_0] : memref<9x128xf32, #tpu.memory_space<vmem>>, vector<9x128xf32>
    %c0_1 = arith.constant 0 : index
    %c0_2 = arith.constant 0 : index
    %c0_3 = arith.constant 0 : index
    %c0_4 = arith.constant 0 : index
    %c0_5 = arith.constant 0 : index
    %1 = vector.load %arg2[%c0_1, %c0_2, %c0_3, %c0_4, %c0_5] : memref<1x1x8x24x128xbf16, #tpu.memory_space<vmem>>, vector<1x1x8x24x128xbf16>
    %2 = vector.shape_cast %1 : vector<1x1x8x24x128xbf16> to vector<8x24x128xbf16>
    %3 = arith.extf %2 : vector<8x24x128xbf16> to vector<8x24x128xf32>
    %4 = vector.extract_strided_slice %0 {offsets = [0, 0], sizes = [1, 128], strides = [1, 1]} : vector<9x128xf32> to vector<1x128xf32>
    %5 = vector.shape_cast %4 : vector<1x128xf32> to vector<128xf32>
    %6 = vector.shape_cast %5 : vector<128xf32> to vector<1x1x128xf32>
    %7 = vector.broadcast %6 : vector<1x1x128xf32> to vector<8x24x128xf32>
    %8 = arith.mulf %3, %7 : vector<8x24x128xf32>
    %c23_i32 = arith.constant 23 : i32
    %9 = tpu.dynamic_rotate %3 by %c23_i32 dim 1 : vector<8x24x128xf32>, i32 -> vector<8x24x128xf32>
    %10 = vector.extract_strided_slice %0 {offsets = [1, 0], sizes = [1, 128], strides = [1, 1]} : vector<9x128xf32> to vector<1x128xf32>
    %11 = vector.shape_cast %10 : vector<1x128xf32> to vector<128xf32>
    %12 = vector.shape_cast %11 : vector<128xf32> to vector<1x1x128xf32>
    %13 = vector.broadcast %12 : vector<1x1x128xf32> to vector<8x24x128xf32>
    %14 = arith.mulf %9, %13 : vector<8x24x128xf32>
    %15 = arith.addf %8, %14 : vector<8x24x128xf32>
    %c22_i32 = arith.constant 22 : i32
    %16 = tpu.dynamic_rotate %3 by %c22_i32 dim 1 : vector<8x24x128xf32>, i32 -> vector<8x24x128xf32>
    %17 = vector.extract_strided_slice %0 {offsets = [2, 0], sizes = [1, 128], strides = [1, 1]} : vector<9x128xf32> to vector<1x128xf32>
    %18 = vector.shape_cast %17 : vector<1x128xf32> to vector<128xf32>
    %19 = vector.shape_cast %18 : vector<128xf32> to vector<1x1x128xf32>
    %20 = vector.broadcast %19 : vector<1x1x128xf32> to vector<8x24x128xf32>
    %21 = arith.mulf %16, %20 : vector<8x24x128xf32>
    %22 = arith.addf %15, %21 : vector<8x24x128xf32>
    %c0_6 = arith.constant 0 : index
    %c0_7 = arith.constant 0 : index
    %c1 = arith.constant 1 : index
    %c0_8 = arith.constant 0 : index
    %c0_9 = arith.constant 0 : index
    %23 = vector.load %arg2[%c0_6, %c0_7, %c1, %c0_8, %c0_9] : memref<1x1x8x24x128xbf16, #tpu.memory_space<vmem>>, vector<1x1x7x24x128xbf16>
    %24 = vector.shape_cast %23 : vector<1x1x7x24x128xbf16> to vector<7x24x128xbf16>
    %c0_10 = arith.constant 0 : index
    %c0_11 = arith.constant 0 : index
    %c0_12 = arith.constant 0 : index
    %c0_13 = arith.constant 0 : index
    %c0_14 = arith.constant 0 : index
    %25 = vector.load %arg3[%c0_10, %c0_11, %c0_12, %c0_13, %c0_14] : memref<1x1x2x24x128xbf16, #tpu.memory_space<vmem>>, vector<1x1x1x24x128xbf16>
    %26 = vector.shape_cast %25 : vector<1x1x1x24x128xbf16> to vector<1x24x128xbf16>
    %27 = tpu.concatenate %24, %26 in 0 : vector<7x24x128xbf16>, vector<1x24x128xbf16> -> vector<8x24x128xbf16>
    %28 = arith.extf %27 : vector<8x24x128xbf16> to vector<8x24x128xf32>
    %29 = vector.extract_strided_slice %0 {offsets = [3, 0], sizes = [1, 128], strides = [1, 1]} : vector<9x128xf32> to vector<1x128xf32>
    %30 = vector.shape_cast %29 : vector<1x128xf32> to vector<128xf32>
    %31 = vector.shape_cast %30 : vector<128xf32> to vector<1x1x128xf32>
    %32 = vector.broadcast %31 : vector<1x1x128xf32> to vector<8x24x128xf32>
    %33 = arith.mulf %28, %32 : vector<8x24x128xf32>
    %34 = arith.addf %22, %33 : vector<8x24x128xf32>
    %c23_i32_15 = arith.constant 23 : i32
    %35 = tpu.dynamic_rotate %28 by %c23_i32_15 dim 1 : vector<8x24x128xf32>, i32 -> vector<8x24x128xf32>
    %36 = vector.extract_strided_slice %0 {offsets = [4, 0], sizes = [1, 128], strides = [1, 1]} : vector<9x128xf32> to vector<1x128xf32>
    %37 = vector.shape_cast %36 : vector<1x128xf32> to vector<128xf32>
    %38 = vector.shape_cast %37 : vector<128xf32> to vector<1x1x128xf32>
    %39 = vector.broadcast %38 : vector<1x1x128xf32> to vector<8x24x128xf32>
    %40 = arith.mulf %35, %39 : vector<8x24x128xf32>
    %41 = arith.addf %34, %40 : vector<8x24x128xf32>
    %c22_i32_16 = arith.constant 22 : i32
    %42 = tpu.dynamic_rotate %28 by %c22_i32_16 dim 1 : vector<8x24x128xf32>, i32 -> vector<8x24x128xf32>
    %43 = vector.extract_strided_slice %0 {offsets = [5, 0], sizes = [1, 128], strides = [1, 1]} : vector<9x128xf32> to vector<1x128xf32>
    %44 = vector.shape_cast %43 : vector<1x128xf32> to vector<128xf32>
    %45 = vector.shape_cast %44 : vector<128xf32> to vector<1x1x128xf32>
    %46 = vector.broadcast %45 : vector<1x1x128xf32> to vector<8x24x128xf32>
    %47 = arith.mulf %42, %46 : vector<8x24x128xf32>
    %48 = arith.addf %41, %47 : vector<8x24x128xf32>
    %c0_17 = arith.constant 0 : index
    %c0_18 = arith.constant 0 : index
    %c2 = arith.constant 2 : index
    %c0_19 = arith.constant 0 : index
    %c0_20 = arith.constant 0 : index
    %49 = vector.load %arg2[%c0_17, %c0_18, %c2, %c0_19, %c0_20] : memref<1x1x8x24x128xbf16, #tpu.memory_space<vmem>>, vector<1x1x6x24x128xbf16>
    %50 = vector.shape_cast %49 : vector<1x1x6x24x128xbf16> to vector<6x24x128xbf16>
    %c0_21 = arith.constant 0 : index
    %c0_22 = arith.constant 0 : index
    %c0_23 = arith.constant 0 : index
    %c0_24 = arith.constant 0 : index
    %c0_25 = arith.constant 0 : index
    %51 = vector.load %arg3[%c0_21, %c0_22, %c0_23, %c0_24, %c0_25] : memref<1x1x2x24x128xbf16, #tpu.memory_space<vmem>>, vector<1x1x2x24x128xbf16>
    %52 = vector.shape_cast %51 : vector<1x1x2x24x128xbf16> to vector<2x24x128xbf16>
    %53 = tpu.concatenate %50, %52 in 0 : vector<6x24x128xbf16>, vector<2x24x128xbf16> -> vector<8x24x128xbf16>
    %54 = arith.extf %53 : vector<8x24x128xbf16> to vector<8x24x128xf32>
    %55 = vector.extract_strided_slice %0 {offsets = [6, 0], sizes = [1, 128], strides = [1, 1]} : vector<9x128xf32> to vector<1x128xf32>
    %56 = vector.shape_cast %55 : vector<1x128xf32> to vector<128xf32>
    %57 = vector.shape_cast %56 : vector<128xf32> to vector<1x1x128xf32>
    %58 = vector.broadcast %57 : vector<1x1x128xf32> to vector<8x24x128xf32>
    %59 = arith.mulf %54, %58 : vector<8x24x128xf32>
    %60 = arith.addf %48, %59 : vector<8x24x128xf32>
    %c23_i32_26 = arith.constant 23 : i32
    %61 = tpu.dynamic_rotate %54 by %c23_i32_26 dim 1 : vector<8x24x128xf32>, i32 -> vector<8x24x128xf32>
    %62 = vector.extract_strided_slice %0 {offsets = [7, 0], sizes = [1, 128], strides = [1, 1]} : vector<9x128xf32> to vector<1x128xf32>
    %63 = vector.shape_cast %62 : vector<1x128xf32> to vector<128xf32>
    %64 = vector.shape_cast %63 : vector<128xf32> to vector<1x1x128xf32>
    %65 = vector.broadcast %64 : vector<1x1x128xf32> to vector<8x24x128xf32>
    %66 = arith.mulf %61, %65 : vector<8x24x128xf32>
    %67 = arith.addf %60, %66 : vector<8x24x128xf32>
    %c22_i32_27 = arith.constant 22 : i32
    %68 = tpu.dynamic_rotate %54 by %c22_i32_27 dim 1 : vector<8x24x128xf32>, i32 -> vector<8x24x128xf32>
    %69 = vector.extract_strided_slice %0 {offsets = [8, 0], sizes = [1, 128], strides = [1, 1]} : vector<9x128xf32> to vector<1x128xf32>
    %70 = vector.shape_cast %69 : vector<1x128xf32> to vector<128xf32>
    %71 = vector.shape_cast %70 : vector<128xf32> to vector<1x1x128xf32>
    %72 = vector.broadcast %71 : vector<1x1x128xf32> to vector<8x24x128xf32>
    %73 = arith.mulf %68, %72 : vector<8x24x128xf32>
    %74 = arith.addf %67, %73 : vector<8x24x128xf32>
    %75 = vector.extract_strided_slice %74 {offsets = [0, 0, 0], sizes = [8, 16, 128], strides = [1, 1, 1]} : vector<8x24x128xf32> to vector<8x16x128xf32>
    %76 = vector.shape_cast %75 : vector<8x16x128xf32> to vector<128x128xf32>
    %77 = arith.truncf %76 : vector<128x128xf32> to vector<128x128xbf16>
    %c0_28 = arith.constant 0 : index
    %c0_29 = arith.constant 0 : index
    %78 = vector.load %arg5[%c0_28, %c0_29] : memref<128x128xbf16, #tpu.memory_space<vmem>>, vector<128x128xbf16>
    %cst = arith.constant dense<0.000000e+00> : vector<128x128xf32>
    %79 = tpu.matmul %77, %78, %cst {dimension_numbers = #tpu.dot_dimension_numbers<[1], [0], [0], [1], [0, 0, 1, 1], [], []>} : vector<128x128xbf16>, vector<128x128xbf16>, vector<128x128xf32> -> vector<128x128xf32>
    %c0_30 = arith.constant 0 : index
    %c0_31 = arith.constant 0 : index
    %80 = vector.load %arg6[%c0_30, %c0_31] : memref<1x128xf32, #tpu.memory_space<vmem>>, vector<1x128xf32>
    %81 = vector.broadcast %80 : vector<1x128xf32> to vector<128x128xf32>
    %82 = arith.addf %79, %81 : vector<128x128xf32>
    %cst_32 = arith.constant 3.000000e+00 : f32
    %83 = vector.broadcast %cst_32 : f32 to vector<128x128xf32>
    %84 = arith.addf %82, %83 : vector<128x128xf32>
    %cst_33 = arith.constant 0.000000e+00 : f32
    %cst_34 = arith.constant 6.000000e+00 : f32
    %85 = vector.broadcast %cst_33 : f32 to vector<128x128xf32>
    %86 = arith.maximumf %85, %84 : vector<128x128xf32>
    %87 = vector.broadcast %cst_34 : f32 to vector<128x128xf32>
    %88 = arith.minimumf %87, %86 : vector<128x128xf32>
    %89 = arith.mulf %82, %88 : vector<128x128xf32>
    %cst_35 = arith.constant 0.166666672 : f32
    %90 = vector.broadcast %cst_35 : f32 to vector<128x128xf32>
    %91 = arith.mulf %89, %90 : vector<128x128xf32>
    %92 = arith.truncf %91 : vector<128x128xf32> to vector<128x128xbf16>
    %93 = vector.shape_cast %92 : vector<128x128xbf16> to vector<8x16x128xbf16>
    %c0_36 = arith.constant 0 : index
    %c0_37 = arith.constant 0 : index
    %c0_38 = arith.constant 0 : index
    %c0_39 = arith.constant 0 : index
    %94 = vector.load %arg7[%c0_36, %c0_37, %c0_38, %c0_39] : memref<1x8x16x128xbf16, #tpu.memory_space<vmem>>, vector<1x8x16x128xbf16>
    %95 = vector.shape_cast %94 : vector<1x8x16x128xbf16> to vector<8x16x128xbf16>
    %96 = vector.shape_cast %93 : vector<8x16x128xbf16> to vector<1x8x16x128xbf16>
    tpu.vector_store %arg7[%c0_36, %c0_37, %c0_38, %c0_39], %96 {strides = array<i32>} : memref<1x8x16x128xbf16, #tpu.memory_space<vmem>>, vector<1x8x16x128xbf16>,
    return
  }
  func.func @transform_0(%arg0: i32, %arg1: i32) -> (i32, i32, i32, i32, i32) {
    %c0_i32 = arith.constant 0 : i32
    %c0_i32_0 = arith.constant 0 : i32
    %c0_i32_1 = arith.constant 0 : i32
    %c0_i32_2 = arith.constant 0 : i32
    return %arg0, %c0_i32, %arg1, %c0_i32_0, %c0_i32_1 : i32, i32, i32, i32, i32
  }
  func.func @transform_1(%arg0: i32, %arg1: i32) -> (i32, i32, i32, i32, i32) {
    %c1_i32 = arith.constant 1 : i32
    %0 = arith.addi %arg1, %c1_i32 : i32
    %c4_i32 = arith.constant 4 : i32
    %1 = arith.muli %0, %c4_i32 : i32
    %c8_i32 = arith.constant 8 : i32
    %2 = arith.minsi %1, %c8_i32 : i32
    %c0_i32 = arith.constant 0 : i32
    %c0_i32_0 = arith.constant 0 : i32
    %c0_i32_1 = arith.constant 0 : i32
    %c0_i32_2 = arith.constant 0 : i32
    return %arg0, %c0_i32, %2, %c0_i32_0, %c0_i32_1 : i32, i32, i32, i32, i32
  }
  func.func @transform_2(%arg0: i32, %arg1: i32) -> (i32, i32) {
    %c0_i32 = arith.constant 0 : i32
    %c0_i32_0 = arith.constant 0 : i32
    %c0_i32_1 = arith.constant 0 : i32
    return %c0_i32, %c0_i32_0 : i32, i32
  }
  func.func @transform_3(%arg0: i32, %arg1: i32) -> (i32, i32) {
    %c0_i32 = arith.constant 0 : i32
    %c0_i32_0 = arith.constant 0 : i32
    %c0_i32_1 = arith.constant 0 : i32
    return %c0_i32, %c0_i32_0 : i32, i32
  }
  func.func @transform_4(%arg0: i32, %arg1: i32) -> (i32, i32) {
    %c0_i32 = arith.constant 0 : i32
    %c0_i32_0 = arith.constant 0 : i32
    %c0_i32_1 = arith.constant 0 : i32
    return %c0_i32, %c0_i32_0 : i32, i32
  }
  func.func @transform_5(%arg0: i32, %arg1: i32) -> (i32, i32, i32, i32) {
    %c0_i32 = arith.constant 0 : i32
    %c0_i32_0 = arith.constant 0 : i32
    %c0_i32_1 = arith.constant 0 : i32
    return %arg0, %arg1, %c0_i32, %c0_i32_0 : i32, i32, i32, i32
  }
}

</mosaic_0001>

<bundles_post_ra>
// kernel: tpu_custom_call.1
= control target key start
LH: loop header
LB: loop body
LE: loop exit
PB: predicated region body
PF: predicated region fallthrough
CT: control target
= control target key end

     0   :  { %s3347_s0 = inlined_call_operand.hbm [shape: bf16[2,1,18,24,128], index: 0, kind: input, shape index: {}]   ;;  %s3348_s1 = inlined_call_operand.hbm [shape: bf16[2,1,18,24,128], index: 1, kind: input, shape index: {}]   ;;  %s3349_s2 = inlined_call_operand.hbm [shape: f32[9,128], index: 2, kind: input, shape index: {}]   ;;  %s3350_s3 = inlined_call_operand.hbm [shape: bf16[128,128], index: 3, kind: input, shape index: {}]   ;;  %s3351_s4 = inlined_call_operand.vmem [shape: f32[1,128], index: 4, kind: input, shape index: {}]   ;;  %s3352_s5 = inlined_call_operand.hbm [shape: bf16[2,16,16,128], index: 5, kind: output, shape index: {}]  }
   0x1   :  { %3373 = sst [smem:[#allocation30_spill]] %s3349_s2 }
   0x2   :  { %3374 = sst [smem:[#allocation31_spill]] %s3350_s3 }
   0x3   :  { %3375 = sst [smem:[#allocation32_spill]] %s3351_s4 }
   0x4   :  { %3376 = sst [smem:[#allocation33_spill]] %s3352_s5 }
   0x5   :  { %10 = vsyncpa [#allocation3], 0 }
   0x6   :  { %12 = vsyncpa [#allocation3 + $0x1], 0 }
   0x7   :  { %13 = vsyncpa [#allocation6], 0 }
   0x8   :  { %15 = vsyncpa [#allocation6 + $0x1], 0 }
   0x9   :  { %16 = vsyncpa [#allocation9], 0 }
   0xa   :  { %17 = vsyncpa [#allocation4], 0 }
   0xb   :  { %19 = vsyncpa [#allocation4 + $0x1], 0  ;;  %s2399_s18 = smov 0   ;;  %s2401_s19 = smov 0  }
   0xc   :  { %s2403_s20 = smov 0   ;;  %s2405_s21 = smov 0  }
   0xd   :  { %s2407_s22 = smov 0   ;;  %s2409_s23 = smov 0  }
   0xe   :  { %s2411_s24 = smov 0   ;;  %s2413_s25 = smov 0  }
   0xf   :  { %s2415_s26 = smov 0   ;;  %s2417_s27 = smov 0  }
  0x10   :  { %s2419_s28 = smov 0  }
  0x11 LB: > { %3377 = sst [smem:[#allocation16_spill]] %s2324_s21  ;;  %s2455_s29 = sadd.s32 4294967295, %s2352_s28   ;;  %s2352_s28 = sphi %s2419_s28, %s25_s28   ;;  %s2348_s27 = sphi %s2417_s27, %s3440_s27   ;;  %s2344_s26 = sphi %s2415_s26, %s3439_s26   ;;  %s2340_s25 = sphi %s2413_s25, %s3438_s25   ;;  %s2336_s24 = sphi %s2411_s24, %s3437_s24   ;;  %s2332_s23 = sphi %s2409_s23, %s3436_s23   ;;  %s2328_s22 = sphi %s2407_s22, %s3435_s22   ;;  %s2324_s21 = sphi %s2405_s21, %s3434_s21   ;;  %s2320_s20 = sphi %s2403_s20, %s3433_s20   ;;  %s2316_s19 = sphi %s2401_s19, %s3432_s19   ;;  %s2312_s18 = sphi %s2399_s18, %s3431_s18  }
  0x12   : > { %3378 = sst [smem:[#allocation17_spill]] %s2336_s24  ;;  %s34_s6 = sadd.s32 1, %s2344_s26 }
  0x13   : > { %3379 = sst [smem:[#allocation18_spill]] %s2340_s25  ;;  %s37_s7 = sadd.s32 1, %s2348_s27 }
  0x14   : > { %p35_p0 = scmp.ge.s32.totalorder %s34_s6, 2  ;;  %s46_s8 = sadd.s32 1, %s2332_s23 }
  0x15   : > { %p53_p1 = scmp.ne.s32.totalorder %s2332_s23, %s2328_s22  ;;  %p54_p2 = scmp.eq.s32.totalorder %s2352_s28, 0 }
  0x16   : > { %s3442_s6 = smov (%p35_p0, %s34_s6), 0  ;;  %s3444_s7 = smov (!%p35_p0, %s37_s7), %s2348_s27 }
  0x17   : > { %3380 = sst [smem:[#allocation19_spill]] %s3442_s6  ;;  %s42_s9 = ssub.s32 %s2344_s26, %s3442_s6 }
  0x18   : > { %p2474_p3 = por %p54_p2, %p53_p1  ;;  %p39_p4 = scmp.ge.s32.totalorder %s3444_s7, 2 }
  0x19   : > { %p3354_p5 = scmp.ne.s32.totalorder %s2328_s22, %s2324_s21  ;;  %p3356_p6 = scmp.eq.s32.totalorder %s2455_s29, 0 }
  0x1a   : > { %s3381_s10 = scalar_select %p2474_p3, 1, 0 }
  0x1b   : > { %s1653_s11 = sshll.u32 %s2344_s26, 2  ;;  %s3446_s7 = smov (%p39_p4, %s3444_s7), 0 }
  0x1c   : > { %3382 = sst [smem:[#allocation20_spill]] %s3446_s7  ;;  %p2489_p7 = por %p3356_p6, %p3354_p5 }
  0x1d   : > { %s1654_s13 = sadd.s32 4, %s1653_s11  ;;  %s41_s14 = ssub.s32 %s2348_s27, %s3446_s7 }
  0x1e   : > { %s3383_s12 = scalar_select %p2489_p7, 1, 0 }
  0x1f   : > { %p71_p8 = scmp.lt.s32.totalorder %s1654_s13, 8  ;;  %s43_s15 = sor.u32 %s42_s9, %s41_s14 }
  0x20   : > { %s1655_s16 = sshll.u32 %s3442_s6, 2  ;;  %p44_p9 = scmp.eq.s32.totalorder %s43_s15, 0 }
  0x21   : > { %s1656_s17 = sadd.s32 4, %s1655_s16  ;;  %s3448_s13 = smov (!%p71_p8, %s1654_s13), 8 }
  0x22   : > { %s2499_s30 = scalar_select %p44_p9, %s2332_s23, %s46_s8  }
  0x23   : > { %p75_p10 = scmp.lt.s32.totalorder %s1656_s17, 8  ;;  %s82_s11 = sadd.s32 1, %s2320_s20 }
  0x24   : > { %3384 = sst [smem:[#allocation21_spill]] %s2499_s30  ;;  %p89_p11 = scmp.ne.s32.totalorder %s2320_s20, %s2316_s19 }
  0x25   : > { %p95_p12 = scmp.ne.s32.totalorder %s2316_s19, %s2312_s18  ;;  %s3450_s17 = smov (!%p75_p10, %s1656_s17), 8 }
  0x26   : > { %p2508_p13 = por %p89_p11, %p54_p2  ;;  %s78_s16 = ssub.s32 %s3448_s13, %s3450_s17 }
  0x27   : > { %p2514_p0 = por %p95_p12, %p3356_p6  ;;  %p184_p4 = scmp.eq.s32.totalorder %s2455_s29, 3 }
  0x28   : > { %s3385_s9 = scalar_select %p2508_p13, 1, 0 }
  0x29   : > { %s3386_s15 = scalar_select %p2514_p0, 1, 0 }
  0x2a   : > { %s79_s8 = sor.u32 %s78_s16, %s41_s14  ;;  %s3388_s7 = sadd.s32 4294967294, %s2352_s28  }
  0x2b   : > { %3387 = sst [smem:[#allocation22_spill]] %s3386_s15  ;;  %p190_p8 = scmp.eq.s32.totalorder %s3388_s7, 3 }
  0x2c   : > { %p80_p9 = scmp.eq.s32.totalorder %s79_s8, 0  ;;  %p2525_p5 = por %p184_p4, %p53_p1 }
  0x2d   : > { %p3391_p2 = scmp.ne.s32.totalorder %s2328_s22, %s2324_s21  ;;  %p1561_p11 = scmp.ge.s32.totalorder %s2352_s28, 1 }
  0x2e   : > { %s3389_s18 = scalar_select %p2525_p5, 1, 0 }
  0x2f   : > { %p2532_p10 = por %p190_p8, %p3391_p2  ;;  %p197_p12 = scmp.lt.s32.totalorder %s2352_s28, 5 }
  0x30   : > { %3390 = sst [smem:[#allocation23_spill]] %s3389_s18  ;;  %s2354_s7 = smov [#allocation7]  }
  0x31   : > { %s3392_s6 = scalar_select %p2532_p10, 1, 0 }
  0x32   : > { %s2538_s30 = scalar_select %p80_p9, %s2320_s20, %s82_s11  }
  0x33   : > { %3393 = sst [smem:[#allocation24_spill]] %s3392_s6  ;;  %p2541_p6 = pnand %p1561_p11, %p197_p12 }
  0x34   : > { %3394 = sst [smem:[#allocation25_spill]] %s2538_s30  ;;  %s209_s14 = sshll.u32 %s2354_s7, 4  ;;  %s210_s14 = int_to_ptr.vmem [resolvable:$true] %s209_s14 }
  0x35   : > { %s3395_s17 = scalar_select %p2541_p6, 1, 0 }
  0x36   : > { %p1980_p1 = pneg %p2541_p6  ;;  %s2355_s16 = smov [#allocation8]  }
  0x37   : > { %s222_s8 = sshll.u32 %s2355_s16, 4  ;;  %p3396_p4 = scmp.eq.s32.totalorder %s2455_s29, 0  ;;  %s2553_s8 = int_to_ptr.vmem [resolvable:$true] %s222_s8 }
  0x38   : > { %s3398_s2 = sld [smem:[#allocation30_spill]] }
  0x39   : > { %p2549_p8 = pnand %p1980_p1, %p3396_p4 }
  0x3b   : > { %p2106_p2 = pneg %p2549_p8 }
  0x3e   : > { %s2104_s6 = scalar_lea.hbm %s3398_s2, 256 }
  0x3f   : > { %p2105_p9 = scmp.ne.s32.totalorder %s3398_s2, %s2104_s6  ;;  %p2111_p1 = scmp.lt.u32.totalorder %s2104_s6, %s3398_s2 }
  0x41   : > { %p2107_p11 = pnand %p2106_p2, %p2105_p9 }
  0x43   : > { %p2108_p12 = pneg %p2107_p11 }
  0x45   : > { %p2113_p4 = pnand %p2111_p1, %p2108_p12 }
  0x47   : > { %2116 = shalt.err (!%p2113_p4)
}
  0x48   : > { %s2117_s25 = scalar_lea.vmem %s210_s14, 256  ;;  %p2125_p7 = scmp.lt.s32.totalorder %s210_s14, %s210_s14 }
  0x49   : > { %p2118_p10 = scmp.ne.s32.totalorder %s210_s14, %s2117_s25  ;;  %p2126_p6 = scmp.lt.s32.totalorder %s2117_s25, %s2117_s25 }
  0x4b   : > { %p2120_p5 = pnand %p2118_p10, %p2106_p2  ;;  %p2127_p13 = por %p2126_p6, %p2125_p7 }
  0x4d   : > { %p2121_p0 = pneg %p2120_p5 }
  0x4f   : > { %p2128_p3 = pnand %p2127_p13, %p2121_p0 }
  0x51   : > { %2131 = shalt.err (!%p2128_p3)
}
  0x52   : > { %s2356_s5 = smov 128   ;;  %s2357_s30 = smov 8  }
  0x53   : > { %1983 = dma.hbm_to_vmem [thread:$0]  (!%p2549_p8), %s3398_s2, 256, %s210_s14, [#allocation6], %s2356_s5, %s2356_s5, %s2357_s30  }
  0x54   : > { %s3399_s3 = sld [smem:[#allocation31_spill]] }
  0x5a   : > { %s2132_s16 = scalar_lea.hbm %s3399_s3, 1024 }
  0x5b   : > { %p2133_p5 = scmp.ne.s32.totalorder %s3399_s3, %s2132_s16  ;;  %p2139_p7 = scmp.lt.u32.totalorder %s2132_s16, %s3399_s3 }
  0x5d   : > { %p2135_p3 = pnand %p2133_p5, %p2106_p2 }
  0x5f   : > { %p2136_p6 = pneg %p2135_p3 }
  0x61   : > { %p2141_p13 = pnand %p2139_p7, %p2136_p6 }
  0x63   : > { %2144 = shalt.err (!%p2141_p13)
}
  0x64   : > { %s2145_s14 = scalar_lea.vmem %s2553_s8, 1024  ;;  %p2153_p11 = scmp.lt.s32.totalorder %s2553_s8, %s2553_s8 }
  0x65   : > { %p2146_p0 = scmp.ne.s32.totalorder %s2553_s8, %s2145_s14  ;;  %p2154_p12 = scmp.lt.s32.totalorder %s2145_s14, %s2145_s14 }
  0x67   : > { %p2148_p10 = pnand %p2146_p0, %p2106_p2  ;;  %p2155_p1 = por %p2154_p12, %p2153_p11 }
  0x69   : > { %p2149_p9 = pneg %p2148_p10 }
  0x6b   : > { %p2156_p4 = pnand %p2155_p1, %p2149_p9 }
  0x6d   : > { %2159 = shalt.err (!%p2156_p4)
}
  0x6e   : > { %s2358_s4 = smov 64   ;;  %s2359_s24 = smov 4  }
  0x6f   : > { %1986 = dma.hbm_to_vmem [thread:$0]  (!%p2549_p8), %s3399_s3, 1024, %s2553_s8, [#allocation9], %s2358_s4, %s2358_s4, %s2359_s24  }
  0x70   : > { %p1564_p5 = scmp.ge.s32.totalorder %s2352_s28, 4 }
  0x71   : > { %p3400_p2 = scmp.ne.s32.totalorder (!%p1564_p5), %s3381_s10, 0 }
  0x72   : > { %235 = sbr.rel (%p1564_p5) target bundleno = 181 (0xb5), region = 28 }
  0x79   : > { %238 = sbr.rel (!%p3400_p2) target bundleno = 151 (0x97), region = 32  ;;  %s239_s30 = sand.u32 (%p3400_p2), 1, %s2332_s23  }
  0x7a   : > { %s1959_s6 = smul.u32 (%p3400_p2), 96, %s239_s30  ;;  %s2606_s18 = scalar_lea.sflag (%p3400_p2), [#allocation3], %s239_s30 }
  0x7b   : > { %s1960_s7 = smul.u32 (%p3400_p2), 24, %s2344_s26  ;;  %s2164_s2 = scalar_lea.hbm (%p3400_p2), %s3347_s0, 6912 }
  0x7c   : > { %s243_s11 = scalar_lea.vmem (%p3400_p2), [#allocation2], %s1959_s6  ;;  %s1961_s21 = smul.u32 (%p3400_p2), 54, %s2348_s27 }
  0x7d   : > { %s261_s16 = sshll.u32 (%p3400_p2), %s243_s11, 4  ;;  %s2610_s16 = int_to_ptr.vmem [resolvable:$true] %s261_s16 }
  0x7e   : > { %s256_s8 = sadd.s32 (%p3400_p2), %s1961_s21, %s1960_s7 }
  0x7f   : > { %s1570_s25 = sshll.u32 (%p3400_p2), %s256_s8, 6 }
  0x80   : > { %s258_s10 = scalar_lea.hbm %s3347_s0, %s1570_s25 }
  0x81   : > { %s2160_s24 = scalar_lea.hbm %s258_s10, 1536  ;;  %p2165_p3 = scmp.lt.u32.totalorder %s258_s10, %s3347_s0 }
  0x82   : > { %p2161_p8 = scmp.ne.s32.totalorder %s258_s10, %s2160_s24  ;;  %p2166_p6 = scmp.lt.u32.totalorder %s2164_s2, %s2160_s24 }
  0x83   : > { %p2168_p13 = scmp.lt.u32.totalorder %s2160_s24, %s258_s10 }
  0x84   : > { %p2167_p7 = por %p2166_p6, %p2165_p3 }
  0x86   : > { %p2169_p0 = por %p2168_p13, %p2167_p7 }
  0x88   : > { %p2170_p10 = pnand %p2169_p0, %p2161_p8 }
  0x8a   : > { %2173 = shalt.err (!%p2170_p10)
}
  0x8b   : > { %s2174_s6 = scalar_lea.vmem %s2610_s16, 1536  ;;  %s2360_s11 = smov [#allocation2]  }
  0x8c   : > { %p2175_p9 = scmp.ne.s32.totalorder %s2610_s16, %s2174_s6  ;;  %s2178_s7 = sshll.u32 %s2360_s11, 4  ;;  %s2179_s7 = int_to_ptr.vmem [resolvable:$false] %s2178_s7 }
  0x8d   : > { %s2180_s21 = scalar_lea.vmem %s2179_s7, 3072  ;;  %p2181_p11 = scmp.lt.s32.totalorder %s2610_s16, %s2179_s7 }
  0x8e   : > { %p2182_p12 = scmp.lt.s32.totalorder %s2180_s21, %s2174_s6 }
  0x90   : > { %p2183_p1 = por %p2182_p12, %p2181_p11 }
  0x92   : > { %p2184_p4 = pnand %p2183_p1, %p2175_p9 }
  0x94   : > { %2187 = shalt.err (!%p2184_p4)
}
  0x95   : > { %s2361_s2 = smov 64   ;;  %s2362_s3 = smov 4  }
  0x96   : > { %267 = dma.hbm_to_vmem [thread:$0]  %s258_s10, 1536, %s2610_s16, %s2606_s18, %s2361_s2, %s2361_s2, %s2362_s3  }
  0x97 PF: > { %s271_s8 = sand.u32 1, %s2352_s28   ;;  %s273_s25 = sand.u32 1, %s2320_s20  }
  0x98   : > { %s1962_s14 = smul.u32 24, %s273_s25  ;;  %s2637_s16 = scalar_lea.sflag [#allocation6], %s271_s8 }
  0x99   : > { %s1963_s4 = smul.u32 6, %s3448_s13  ;;  %p3401_p2 = scmp.ne.s32.totalorder %s3385_s9, 0 }
  0x9a   : > { %s1964_s24 = smul.u32 54, %s2348_s27  ;;  %s275_s15 = scalar_lea.vmem [#allocation5], %s1962_s14 }
  0x9b   : > { %s289_s5 = sshll.u32 %s275_s15, 4  ;;  %s2192_s2 = scalar_lea.hbm %s3348_s1, 6912  ;;  %s2630_s5 = int_to_ptr.vmem [resolvable:$true] %s289_s5 }
  0x9c   : > { %s286_s30 = sadd.s32 %s1964_s24, %s1963_s4 }
  0x9d   : > { %s1576_s6 = sshll.u32 %s286_s30, 6 }
  0x9e   : > { %s2635_s18 = scalar_lea.hbm %s3348_s1, %s1576_s6 }
  0x9f   : > { %s2188_s10 = scalar_lea.hbm %s2635_s18, 384  ;;  %p2193_p6 = scmp.lt.u32.totalorder %s2635_s18, %s3348_s1 }
  0xa0   : > { %p2189_p5 = scmp.ne.s32.totalorder %s2635_s18, %s2188_s10  ;;  %p2194_p7 = scmp.lt.u32.totalorder %s2192_s2, %s2188_s10 }
  0xa1   : > { %p2196_p0 = scmp.lt.u32.totalorder %s2188_s10, %s2635_s18 }
  0xa2   : > { %p2190_p8 = pnand %p2189_p5, %p3401_p2  ;;  %p2195_p13 = por %p2194_p7, %p2193_p6 }
  0xa4   : > { %p2191_p3 = pneg %p2190_p8  ;;  %p2197_p10 = por %p2196_p0, %p2195_p13 }
  0xa6   : > { %p2198_p9 = pnand %p2197_p10, %p2191_p3 }
  0xa8   : > { %2201 = shalt.err (!%p2198_p9)
}
  0xa9   : > { %s2202_s8 = scalar_lea.vmem %s2630_s5, 384  ;;  %s2363_s14 = smov [#allocation5]  }
  0xaa   : > { %p2203_p11 = scmp.ne.s32.totalorder %s2630_s5, %s2202_s8  ;;  %s2206_s4 = sshll.u32 %s2363_s14, 4  ;;  %s2207_s4 = int_to_ptr.vmem [resolvable:$false] %s2206_s4 }
  0xab   : > { %s2208_s24 = scalar_lea.vmem %s2207_s4, 768  ;;  %p2209_p4 = scmp.lt.s32.totalorder %s2630_s5, %s2207_s4 }
  0xac   : > { %p2204_p12 = pnand %p2203_p11, %p3401_p2  ;;  %p2210_p5 = scmp.lt.s32.totalorder %s2208_s24, %s2202_s8 }
  0xae   : > { %p2205_p1 = pneg %p2204_p12  ;;  %p2211_p8 = por %p2210_p5, %p2209_p4 }
  0xb0   : > { %p2212_p6 = pnand %p2211_p8, %p2205_p1 }
  0xb2   : > { %2215 = shalt.err (!%p2212_p6)
}
  0xb3   : > { %s2364_s15 = smov 64   ;;  %s2365_s30 = smov 4  }
  0xb4   : > { %1971 = dma.hbm_to_vmem [thread:$0]  (%p3401_p2), %s2635_s18, 384, %s2630_s5, %s2637_s16, %s2364_s15, %s2364_s15, %s2365_s30  }
  0xb5 PF: > { %p3402_p3 = scmp.ne.s32.totalorder %s3395_s17, 0 }
  0xb7   : > { %301 = sbr.rel (%p3402_p3) target bundleno = 573 (0x23d), region = 40 }
  0xbe   : > { %s2664_s6 = sand.u32 1, %s2328_s22   ;;  %p3403_p7 = scmp.ne.s32.totalorder %s3383_s12, 0 }
  0xbf   : > { %s1965_s11 = smul.u32 96, %s2664_s6  ;;  %s304_s7 = scalar_lea.sflag [#allocation3], %s2664_s6 }
  0xc1   : > { %s2668_s10 = scalar_lea.vmem [#allocation2], %s1965_s11 }
  0xc2   : > { %2289 = dma.done.wait (%p3403_p7), %s304_s7, 1536  }
  0xc3   : > { %2291 = vsyncadd (%p3403_p7), %s304_s7, 4294965760  ;;  %s3404_s9 = sld [smem:[#allocation22_spill]]  ;;  %s312_s17 = sand.u32 1, %s2455_s29  }
  0xc4   : > { %s314_s5 = sand.u32 1, %s2316_s19   ;;  %s313_s16 = scalar_lea.sflag [#allocation6], %s312_s17 }
  0xc5   : > { %s1966_s18 = smul.u32 24, %s314_s5 }
  0xc7   : > { %s2676_s13 = scalar_lea.vmem [#allocation5], %s1966_s18 }
  0xc9   : > { %p3405_p2 = scmp.ne.s32.totalorder %s3404_s9, 0 }
  0xcb   : > { %2293 = dma.done.wait (%p3405_p2), %s313_s16, 384  }
  0xcc   : > { %2295 = vsyncadd (%p3405_p2), %s313_s16, 4294966912  ;;  %p3406_p13 = scmp.eq.s32.totalorder %s2455_s29, 0 }
  0xce   : > { %2297 = dma.done.wait (%p3406_p13), [#allocation6], 256   ;;  %p3407_p0 = pmov %p3406_p13 }
  0xd0   : > { %2299 = vsyncadd (%p3407_p0), [#allocation6], 4294967040  ;;  %p3408_p10 = pmov %p3407_p0 }
  0xd1   : > { %p3409_p9 = pmov %p3407_p0 }
  0xd2   : > { %2301 = dma.done.wait (%p3408_p10), [#allocation9], 1024  }
  0xd3   : > { %2303 = vsyncadd (%p3409_p9), [#allocation9], 4294966272  ;;  %v419_v0 = vlaneseq  ;;  %v2096_v1 = vld [vmem:[#allocation8] sm:$0xff]   ;;  %v2097_v3 = vld [vmem:[#allocation8 + $0x8] sm:$0xff]   ;;  %s3418_s21 = sld [smem:[#allocation32_spill]]  ;;  %s1580_s2 = sshll.u32 %s2664_s6, 6 }
  0xd4   : > { %1911 = vmatprep.subr.bf16.mxu0 %v2096_v1  ;;  %1943 = vmatprep.subr.bf16.mxu1 %v2096_v1  ;;  %v2098_v4 = vld [vmem:[#allocation8 + $0x10] sm:$0xff]   ;;  %v2099_v10 = vld [vmem:[#allocation8 + $0x18] sm:$0xff]   ;;  %v1677_v12 = vld [vmem:[%s2668_s10] sm:$0xff]   ;;  %s3257_s3 = scalar_lea.vmem [#allocation10], %s1580_s2  ;;  %s3419_s25 = sld [smem:[#allocation17_spill]] }
  0xd5   : > { %v2690_v2 = vshrl.u32 %v419_v0, 7  ;;  %1912 = vmatpush3.bf16.msra.mxu0 %v2096_v1  ;;  %1951 = vmatpush3.bf16.msra.mxu1 %v2096_v1  ;;  %v2699_v11 = vld [vmem:[#allocation7] sm:$0xff]  ;;  %v1678_v16 = vunpack.c.l.bf16 %v1677_v12  ;;  %v1679_v17 = vunpack.c.h.bf16 %v1677_v12  ;;  %v1856_v18 = vld [vmem:[%s2668_s10 + $0x8] sm:$0xff]   ;;  %v2100_v31 = vld [vmem:[#allocation8 + $0x20] sm:$0xff]   ;;  %s3420_s8 = sld [smem:[#allocation18_spill]]  ;;  %s3421_s15 = sld [smem:[#allocation23_spill]] }
  0xd6   : > { %1913 = vmatprep.subr.bf16.mxu0 %v2097_v3  ;;  %1944 = vmatprep.subr.bf16.mxu1 %v2097_v3  ;;  %v1867_v21 = vld [vmem:[%s2668_s10 + $0x10] sm:$0xff]   ;;  %v1682_v22 = vunpack.c.l.bf16 %v1856_v18  ;;  %v2713_v23 = vunpack.c.h.bf16 %v1856_v18  ;;  %v1581_v25 = vld [vmem:[%s2668_s10 + $0xc] sm:$0xf]  ;;  %v1877_v53 = vld [vmem:[%s2668_s10 + $0x18] sm:$0xff]   ;;  %s1422_s11 = sshll.u32 %s3257_s3, 4  ;;  %s3422_s9 = sld [smem:[#allocation33_spill]]  ;;  %s3282_s11 = int_to_ptr.vmem [resolvable:$true] %s1422_s11 }
  0xd7   : > { %v421_v5 = vsub.s32 0, %v2690_v2  ;;  %vm465_vm0 = vcmp.lt.s32.totalorder %v2690_v2, 7  ;;  %v484_v6 = vsub.s32 1, %v2690_v2  ;;  %vm542_vm1 = vcmp.lt.s32.totalorder %v2690_v2, 6  ;;  %v2101_v48 = vld [vmem:[#allocation8 + $0x28] sm:$0xff]   ;;  %v1878_v62 = vld [vmem:[%s2668_s10 + $0x20] sm:$0xff]  }
  0xd8   : > { %v561_v7 = vsub.s32 2, %v2690_v2  ;;  %v646_v8 = vsub.s32 3, %v2690_v2  ;;  %v722_v9 = vsub.s32 4, %v2690_v2  ;;  %v798_v13 = vsub.s32 5, %v2690_v2  ;;  %s1406_s5 = scalar_lea.sflag [#allocation4], %s2664_s6  ;;  %s2216_s18 = scalar_lea.vmem %s3282_s11, 1024 }
  0xd9   : > { %1914 = vmatpush3.bf16.msra.mxu0 %v2097_v3  ;;  %1952 = vmatpush3.bf16.msra.mxu1 %v2097_v3  ;;  %v883_v14 = vsub.s32 6, %v2690_v2  ;;  %v959_v15 = vsub.s32 7, %v2690_v2  ;;  %v2707_v19 = vrot.slane %v2699_v11, %v421_v5  ;;  %v2710_v20 = vrot.slane %v2699_v11, %v484_v6  ;;  %p2217_p11 = scmp.ne.s32.totalorder %s3282_s11, %s2216_s18  ;;  %s2366_s16 = smov [#allocation10]  }
  0xda   : > { %1915 = vmatprep.subr.bf16.mxu0 %v2098_v4  ;;  %1945 = vmatprep.subr.bf16.mxu1 %v2098_v4  ;;  %v2716_v24 = vrot.slane %v2699_v11, %v561_v7  ;;  %v2719_v26 = vunpack.c.l.bf16 %v1867_v21  ;;  %v439_v29 = vrot.slane %v1678_v16, 1  ;;  %v447_v30 = vrot.slane %v1679_v17, 1  ;;  %s1675_s14 = sshll.u32 %s3419_s25, 4 }
  0xdb   : > { %v423_v27 = vmul.f32 %v1678_v16, %v2707_v19  ;;  %v424_v28 = vmul.f32 %v1679_v17, %v2707_v19  ;;  %v455_v32 = vrot.slane %v1682_v22, 1  ;;  %v518_v33 = vrot.slane %v1678_v16, 2  ;;  %s1649_s4 = sshll.u32 %s3420_s8, 5  ;;  %p3423_p12 = scmp.ne.s32.totalorder %s3421_s15, 0 }
  0xdc   : > { %v526_v34 = vrot.slane %v1679_v17, 2  ;;  %v534_v35 = vrot.slane %v1682_v22, 2  ;;  %v474_v36 = vsel %vm465_vm0, %v439_v29, %v447_v30  ;;  %v1727_v37 = vunpack.c.h.bf16 %v1867_v21  ;;  %v2103_v29 = vld [vmem:[#allocation8 + $0x38] sm:$0xff]   ;;  %s1419_s24 = sadd.s32 %s1675_s14, %s1649_s4 }
  0xdd   : > { %1916 = vmatpush3.bf16.msra.mxu0 %v2098_v4  ;;  %1953 = vmatpush3.bf16.msra.mxu1 %v2098_v4  ;;  %v620_v38 = vunpack.c.l.bf16 %v1581_v25  ;;  %v2726_v39 = vrot.slane %v2699_v11, %v646_v8  ;;  %v466_v40 = vsel %vm465_vm0, %v447_v30, %v455_v32  ;;  %v486_v41 = vmul.f32 %v2710_v20, %v474_v36  ;;  %v2102_v4 = vld [vmem:[#allocation8 + $0x30] sm:$0xff]   ;;  %s1650_s30 = sshll.u32 %s1419_s24, 6  ;;  %p2218_p1 = pnand %p2217_p11, %p3423_p12 }
  0xde   : > { %1917 = vmatprep.subr.bf16.mxu0 %v2099_v10  ;;  %1946 = vmatprep.subr.bf16.mxu1 %v2099_v10  ;;  %v543_v42 = vsel %vm542_vm1, %v526_v34, %v534_v35  ;;  %v551_v43 = vsel %vm542_vm1, %v518_v33, %v526_v34  ;;  %v487_v44 = vmul.f32 %v2710_v20, %v466_v40  ;;  %v2742_v52 = vrot.slane %v2719_v26, 1  ;;  %v1861_v33 = vld [vmem:[%s2668_s10 + $0x30] sm:$0xff]   ;;  %v2808_v40 = vld [vmem:[#allocation7 + $0x8] ss:$0 sm:$0xff]  ;;  %s3280_s17 = scalar_lea.hbm %s3422_s9, %s1650_s30 }
  0xdf   : > { %v563_v45 = vmul.f32 %v2716_v24, %v551_v43  ;;  %v564_v46 = vmul.f32 %v2716_v24, %v543_v42  ;;  %v680_v47 = vrot.slane %v620_v38, 1  ;;  %v502_v49 = vadd.f32 %v486_v41, %v423_v27  ;;  %p2219_p4 = pneg %p2218_p1 }
  0xe0   : > { %v648_v50 = vmul.f32 %v2726_v39, %v620_v38  ;;  %v649_v51 = vmul.f32 %v2719_v26, %v2726_v39  ;;  %v503_v54 = vadd.f32 %v487_v44, %v424_v28  ;;  %v696_v55 = vrot.slane %v1727_v37, 1 }
  0xe1   : > { %1918 = vmatpush3.bf16.msra.mxu0 %v2099_v10  ;;  %1954 = vmatpush3.bf16.msra.mxu1 %v2099_v10  ;;  %v2746_v56 = vrot.slane %v2699_v11, %v722_v9  ;;  %v756_v57 = vrot.slane %v620_v38, 2  ;;  %v579_v58 = vadd.f32 %v563_v45, %v502_v49  ;;  %v712_v59 = vsel %vm465_vm0, %v680_v47, %v2742_v52  ;;  %v1862_v38 = vld [vmem:[%s2668_s10 + $0x38] sm:$0xff]  }
  0xe2   : > { %1919 = vmatprep.subr.bf16.mxu0 %v2100_v31  ;;  %1947 = vmatprep.subr.bf16.mxu1 %v2100_v31  ;;  %v2752_v60 = vrot.slane %v2719_v26, 2  ;;  %v772_v61 = vrot.slane %v1727_v37, 2  ;;  %v580_v63 = vadd.f32 %v564_v46, %v503_v54  ;;  %v2758_v0 = vsel %vm465_vm0, %v2742_v52, %v696_v55 }
  0xe3   : > { %v724_v1 = vmul.f32 %v2746_v56, %v712_v59  ;;  %v2761_v3 = vunpack.c.l.bf16 %v1877_v53  ;;  %v664_v5 = vadd.f32 %v648_v50, %v579_v58  ;;  %v725_v6 = vmul.f32 %v2746_v56, %v2758_v0 }
  0xe4   : > { %v2768_v7 = vsel %vm542_vm1, %v2752_v60, %v772_v61  ;;  %v2770_v8 = vunpack.c.h.bf16 %v1877_v53  ;;  %v665_v9 = vadd.f32 %v649_v51, %v580_v63  ;;  %v788_v10 = vsel %vm542_vm1, %v756_v57, %v2752_v60  ;;  %v1873_v57 = vld [vmem:[%s2668_s10 + $0x40] sm:$0xff]  }
  0xe5   : > { %1920 = vmatpush3.bf16.msra.mxu0 %v2100_v31  ;;  %1955 = vmatpush3.bf16.msra.mxu1 %v2100_v31  ;;  %v2778_v12 = vrot.slane %v2699_v11, %v798_v13  ;;  %v1774_v16 = vunpack.c.l.bf16 %v1878_v62  ;;  %v740_v17 = vadd.f32 %v724_v1, %v664_v5  ;;  %v2780_v18 = vunpack.c.h.bf16 %v1878_v62 }
  0xe6   : > { %1921 = vmatprep.subr.bf16.mxu0 %v2101_v48  ;;  %1948 = vmatprep.subr.bf16.mxu1 %v2101_v48  ;;  %v2785_v21 = vrot.slane %v2699_v11, %v883_v14  ;;  %v917_v22 = vrot.slane %v2761_v3, 1  ;;  %v741_v25 = vadd.f32 %v725_v6, %v665_v9  ;;  %v925_v28 = vrot.slane %v2770_v8, 1 }
  0xe7   : > { %v800_v27 = vmul.f32 %v2778_v12, %v788_v10  ;;  %v801_v13 = vmul.f32 %v2778_v12, %v2768_v7  ;;  %v933_v31 = vrot.slane %v1774_v16, 1  ;;  %v2799_v32 = vrot.slane %v2699_v11, %v959_v15 }
  0xe8   : > { %v885_v14 = vmul.f32 %v2761_v3, %v2785_v21  ;;  %v886_v30 = vmul.f32 %v2770_v8, %v2785_v21  ;;  %v2804_v36 = vsel %vm465_vm0, %v917_v22, %v925_v28  ;;  %v993_v37 = vrot.slane %v2761_v3, 2 }
  0xe9   : > { %1922 = vmatpush3.bf16.msra.mxu0 %v2101_v48  ;;  %1956 = vmatpush3.bf16.msra.mxu1 %v2101_v48  ;;  %v816_v34 = vadd.f32 %v800_v27, %v740_v17  ;;  %v817_v35 = vadd.f32 %v801_v13, %v741_v25  ;;  %v2812_v41 = vsel %vm465_vm0, %v925_v28, %v933_v31  ;;  %v1001_v15 = vrot.slane %v2770_v8, 2 }
  0xea   : > { %1923 = vmatprep.subr.bf16.mxu0 %v2102_v4  ;;  %1949 = vmatprep.subr.bf16.mxu1 %v2102_v4  ;;  %v961_v11 = vmul.f32 %v2799_v32, %v2804_v36  ;;  %v1009_v42 = vrot.slane %v1774_v16, 2  ;;  %v962_v45 = vmul.f32 %v2799_v32, %v2812_v41  ;;  %v2819_v46 = vunpack.c.l.bf16 %v1861_v33 }
  0xeb   : > { %v901_v43 = vadd.f32 %v885_v14, %v816_v34  ;;  %v902_v44 = vadd.f32 %v886_v30, %v817_v35  ;;  %v2827_v48 = vsel %vm542_vm1, %v993_v37, %v1001_v15  ;;  %v2829_v49 = vunpack.c.h.bf16 %v1861_v33  ;;  %v1883_v35 = vld [vmem:[%s2668_s10 + $0x48] sm:$0xff]  }
  0xec   : > { %v2823_v47 = vsel %vm542_vm1, %v1001_v15, %v1009_v42  ;;  %v1706_v50 = vunpack.c.l.bf16 %v1862_v38  ;;  %v1037_v54 = vmul.f32 %v2808_v40, %v2827_v48  ;;  %v2836_v58 = vunpack.c.h.bf16 %v1862_v38 }
  0xed   : > { %1924 = vmatpush3.bf16.msra.mxu0 %v2102_v4  ;;  %1957 = vmatpush3.bf16.msra.mxu1 %v2102_v4  ;;  %v977_v51 = vadd.f32 %v961_v11, %v901_v43  ;;  %v978_v53 = vadd.f32 %v962_v45, %v902_v44  ;;  %v1038_v55 = vmul.f32 %v2808_v40, %v2823_v47  ;;  %v443_v62 = vrot.slane %v2819_v46, 1 }
  0xee   : > { %1925 = vmatprep.subr.bf16.mxu0 %v2103_v29  ;;  %1950 = vmatprep.subr.bf16.mxu1 %v2103_v29  ;;  %v431_v59 = vmul.f32 %v2819_v46, %v2707_v19  ;;  %v432_v61 = vmul.f32 %v2829_v49, %v2707_v19  ;;  %v451_v4 = vrot.slane %v2829_v49, 1  ;;  %v459_v5 = vrot.slane %v1706_v50, 1 }
  0xef   : > { %v1053_v63 = vadd.f32 %v1037_v54, %v977_v51  ;;  %v1054_v1 = vadd.f32 %v1038_v55, %v978_v53  ;;  %v522_v6 = vrot.slane %v2819_v46, 2  ;;  %v530_v9 = vrot.slane %v2829_v49, 2  ;;  %v1884_v55 = vld [vmem:[%s2668_s10 + $0x50] sm:$0xff]  }
  0xf0   : > { %v538_v10 = vrot.slane %v1706_v50, 2  ;;  %v2846_v16 = vunpack.c.l.bf16 %v1873_v57  ;;  %v2850_v22 = vsel %vm465_vm0, %v451_v4, %v459_v5  ;;  %v2854_v25 = vsel %vm465_vm0, %v443_v62, %v451_v4 }
  0xf1   : > { %1926 = vmatpush3.bf16.msra.mxu0 %v2103_v29  ;;  %1958 = vmatpush3.bf16.msra.mxu1 %v2103_v29  ;;  %v1069_v17 = vpack.c.bf16 %v1054_v1, %v1053_v63  ;;  %v1751_v27 = vunpack.c.h.bf16 %v1873_v57  ;;  %v494_v13 = vmul.f32 %v2710_v20, %v2854_v25  ;;  %v495_v28 = vmul.f32 %v2710_v20, %v2850_v22 }
  0xf2   : > { %v2862_v29 = vsel %vm542_vm1, %v530_v9, %v538_v10  ;;  %v2866_v14 = vsel %vm542_vm1, %v522_v6, %v530_v9  ;;  %v656_v33 = vmul.f32 %v2836_v58, %v2726_v39  ;;  %v657_v34 = vmul.f32 %v2846_v16, %v2726_v39 }
  0xf3   : > { %1927 = vmatprep.mubr.bf16.mxu0 %v1069_v17  ;;  %v571_v30 = vmul.f32 %v2716_v24, %v2866_v14  ;;  %v572_v31 = vmul.f32 %v2716_v24, %v2862_v29  ;;  %v510_v37 = vadd.f32 %v494_v13, %v431_v59  ;;  %v511_v38 = vadd.f32 %v495_v28, %v432_v61 }
  0xf4   : > { %v684_v11 = vrot.slane %v2836_v58, 1  ;;  %v692_v15 = vrot.slane %v2846_v16, 1  ;;  %v700_v42 = vrot.slane %v1751_v27, 1  ;;  %v760_v43 = vrot.slane %v2836_v58, 2 }
  0xf5   : > { %v768_v44 = vrot.slane %v2846_v16, 2  ;;  %v776_v45 = vrot.slane %v1751_v27, 2  ;;  %v587_v50 = vadd.f32 %v571_v30, %v510_v37  ;;  %v588_v51 = vadd.f32 %v572_v31, %v511_v38 }
  0xf6   : > { %v2883_v53 = vsel %vm465_vm0, %v684_v11, %v692_v15  ;;  %v2885_v54 = vunpack.c.l.bf16 %v1883_v35  ;;  %v2890_v57 = vsel %vm465_vm0, %v692_v15, %v700_v42  ;;  %v2908_v9 = vunpack.c.h.bf16 %v1883_v35 }
  0xf7   : > { %3410 = vst [vmem:[#allocation26_spill] sm:$0xff] %v2883_v53  ;;  %3411 = vst [vmem:[#allocation27_spill] sm:$0xff] %v2890_v57  ;;  %v732_v59 = vmul.f32 %v2746_v56, %v2883_v53  ;;  %v2896_v61 = vsel %vm542_vm1, %v768_v44, %v776_v45  ;;  %v2900_v62 = vsel %vm542_vm1, %v760_v43, %v768_v44  ;;  %v1798_v10 = vunpack.c.l.bf16 %v1884_v55 }
  0xf8   : > { %3412 = vst [vmem:[#allocation28_spill] sm:$0xff] %v2896_v61  ;;  %3413 = vst [vmem:[#allocation29_spill] sm:$0xff] %v2900_v62  ;;  %v672_v63 = vadd.f32 %v656_v33, %v587_v50  ;;  %v673_v1 = vadd.f32 %v657_v34, %v588_v51  ;;  %v733_v4 = vmul.f32 %v2746_v56, %v2890_v57  ;;  %v2910_v17 = vunpack.c.h.bf16 %v1884_v55 }
  0xf9   : > { %v808_v5 = vmul.f32 %v2778_v12, %v2900_v62  ;;  %v809_v6 = vmul.f32 %v2778_v12, %v2896_v61  ;;  %v893_v28 = vmul.f32 %v2885_v54, %v2785_v21  ;;  %v921_v30 = vrot.slane %v2885_v54, 1 }
  0xfa   : > { %v748_v27 = vadd.f32 %v732_v59, %v672_v63  ;;  %v749_v13 = vadd.f32 %v733_v4, %v673_v1  ;;  %v894_v31 = vmul.f32 %v2908_v9, %v2785_v21  ;;  %v929_v33 = vrot.slane %v2908_v9, 1 }
  0xfb   : > { %v937_v34 = vrot.slane %v1798_v10, 1  ;;  %v997_v37 = vrot.slane %v2885_v54, 2  ;;  %v1005_v11 = vrot.slane %v2908_v9, 2  ;;  %v1013_v15 = vrot.slane %v1798_v10, 2 }
  0xfc   : > { %v824_v35 = vadd.f32 %v808_v5, %v748_v27  ;;  %v825_v38 = vadd.f32 %v809_v6, %v749_v13  ;;  %v2926_v43 = vsel %vm465_vm0, %v921_v30, %v929_v33  ;;  %v425_v44 = vmul.f32 %v2713_v23, %v2707_v19 }
  0xfd   : > { %v2922_v42 = vsel %vm465_vm0, %v929_v33, %v937_v34  ;;  %v426_v45 = vmul.f32 %v2719_v26, %v2707_v19  ;;  %v969_v55 = vmul.f32 %v2799_v32, %v2926_v43  ;;  %v2938_v63 = vsel %vm542_vm1, %v1005_v11, %v1013_v15 }
  0xfe   : > { %v909_v50 = vadd.f32 %v893_v28, %v824_v35  ;;  %v910_v51 = vadd.f32 %v894_v31, %v825_v38  ;;  %v970_v59 = vmul.f32 %v2799_v32, %v2922_v42  ;;  %v2942_v1 = vsel %vm542_vm1, %v997_v37, %v1005_v11  ;;  %v1879_v35 = vld [vmem:[%s2668_s10 + $0x28] sm:$0xff]  }
  0xff   : > { %v440_v4 = vrot.slane %v2713_v23, 1  ;;  %v489_v26 = vmul.f32 %v2758_v0, %v2710_v20  ;;  %v1045_v10 = vmul.f32 %v2808_v40, %v2942_v1  ;;  %v1046_v27 = vmul.f32 %v2808_v40, %v2938_v63 }
 0x100   : > { %v985_v5 = vadd.f32 %v969_v55, %v909_v50  ;;  %v986_v6 = vadd.f32 %v970_v59, %v910_v51  ;;  %v519_v30 = vrot.slane %v2713_v23, 2  ;;  %v566_v31 = vmul.f32 %v2768_v7, %v2716_v24 }
 0x101   : > { %v475_v13 = vsel %vm465_vm0, %v440_v4, %v2742_v52  ;;  %v505_v28 = vadd.f32 %v489_v26, %v426_v45  ;;  %v650_v37 = vmul.f32 %v2761_v3, %v2726_v39  ;;  %v651_v52 = vmul.f32 %v2770_v8, %v2726_v39 }
 0x102   : > { %v1061_v33 = vadd.f32 %v1045_v10, %v985_v5  ;;  %v1062_v0 = vadd.f32 %v1046_v27, %v986_v6  ;;  %v488_v34 = vmul.f32 %v2710_v20, %v475_v13  ;;  %v552_v38 = vsel %vm542_vm1, %v519_v30, %v2752_v60 }
 0x103   : > { %v582_v11 = vadd.f32 %v566_v31, %v505_v28  ;;  %v726_v23 = vmul.f32 %v2804_v36, %v2746_v56  ;;  %v565_v45 = vmul.f32 %v2716_v24, %v552_v38  ;;  %v727_v50 = vmul.f32 %v2812_v41, %v2746_v56 }
 0x104   : > { %v1073_v7 = vpack.c.bf16 %v1062_v0, %v1061_v33  ;;  %v504_v15 = vadd.f32 %v488_v34, %v425_v44  ;;  %v802_v55 = vmul.f32 %v2827_v48, %v2778_v12  ;;  %v803_v60 = vmul.f32 %v2823_v47, %v2778_v12 }
 0x105   : > { %v667_v51 = vadd.f32 %v651_v52, %v582_v11  ;;  %v2975_v59 = vunpack.c.l.bf16 %v1879_v35  ;;  %v1779_v26 = vunpack.c.h.bf16 %v1879_v35  ;;  %v887_v44 = vmul.f32 %v2780_v18, %v2785_v21 }
 0x106   : > { %1935 = vmatprep.mubr.bf16.mxu1 %v1073_v7  ;;  %v581_v4 = vadd.f32 %v565_v45, %v504_v15  ;;  %v918_v5 = vrot.slane %v2780_v18, 1  ;;  %v994_v13 = vrot.slane %v2780_v18, 2  ;;  %v433_v35 = vmul.f32 %v2836_v58, %v2707_v19 }
 0x107   : > { %v743_v6 = vadd.f32 %v727_v50, %v667_v51  ;;  %v888_v10 = vmul.f32 %v2975_v59, %v2785_v21  ;;  %v926_v27 = vrot.slane %v2975_v59, 1  ;;  %v934_v30 = vrot.slane %v1779_v26, 1 }
 0x108   : > { %v666_v28 = vadd.f32 %v650_v37, %v581_v4  ;;  %v1002_v31 = vrot.slane %v2975_v59, 2  ;;  %v1010_v33 = vrot.slane %v1779_v26, 2  ;;  %v434_v38 = vmul.f32 %v2846_v16, %v2707_v19 }
 0x109   : > { %v819_v0 = vadd.f32 %v803_v60, %v743_v6  ;;  %v2987_v34 = vsel %vm465_vm0, %v918_v5, %v926_v27  ;;  %v2995_v52 = vsel %vm465_vm0, %v926_v27, %v934_v30  ;;  %v497_v4 = vmul.f32 %v2890_v57, %v2710_v20 }
 0x10a   : > { %v742_v11 = vadd.f32 %v726_v23, %v666_v28  ;;  %v963_v37 = vmul.f32 %v2799_v32, %v2987_v34  ;;  %v3001_v7 = vsel %vm542_vm1, %v1002_v31, %v1010_v33  ;;  %v964_v45 = vmul.f32 %v2799_v32, %v2995_v52  ;;  %v1885_v28 = vld [vmem:[%s2668_s10 + $0x58] sm:$0xff]  }
 0x10b   : > { %v904_v15 = vadd.f32 %v888_v10, %v819_v0  ;;  %v3007_v50 = vsel %vm542_vm1, %v994_v13, %v1002_v31  ;;  %v1040_v23 = vmul.f32 %v2808_v40, %v3001_v7  ;;  %v574_v5 = vmul.f32 %v2896_v61, %v2716_v24 }
 0x10c   : > { %v818_v51 = vadd.f32 %v802_v55, %v742_v11  ;;  %v1039_v60 = vmul.f32 %v2808_v40, %v3007_v50  ;;  %v658_v6 = vmul.f32 %v2885_v54, %v2726_v39  ;;  %v513_v27 = vadd.f32 %v497_v4, %v434_v38 }
 0x10d   : > { %v980_v26 = vadd.f32 %v964_v45, %v904_v15  ;;  %v659_v13 = vmul.f32 %v2908_v9, %v2726_v39  ;;  %v496_v30 = vmul.f32 %v2883_v53, %v2710_v20  ;;  %v734_v31 = vmul.f32 %v2926_v43, %v2746_v56 }
 0x10e   : > { %v903_v10 = vadd.f32 %v887_v44, %v818_v51  ;;  %v573_v0 = vmul.f32 %v2900_v62, %v2716_v24  ;;  %v590_v11 = vadd.f32 %v574_v5, %v513_v27  ;;  %v735_v44 = vmul.f32 %v2922_v42, %v2746_v56 }
 0x10f   : > { %v1056_v55 = vadd.f32 %v1040_v23, %v980_v26  ;;  %v512_v38 = vadd.f32 %v496_v30, %v433_v35  ;;  %v810_v15 = vmul.f32 %v2942_v1, %v2778_v12  ;;  %v811_v45 = vmul.f32 %v2938_v63, %v2778_v12 }
 0x110   : > { %v979_v33 = vadd.f32 %v963_v37, %v903_v10  ;;  %v3034_v23 = vunpack.c.l.bf16 %v1885_v28  ;;  %v675_v4 = vadd.f32 %v659_v13, %v590_v11  ;;  %v1803_v26 = vunpack.c.h.bf16 %v1885_v28 }
 0x111   : > { %v895_v37 = vmul.f32 %v2910_v17, %v2785_v21  ;;  %v589_v10 = vadd.f32 %v573_v0, %v512_v38  ;;  %v922_v35 = vrot.slane %v2910_v17, 1  ;;  %v998_v57 = vrot.slane %v2910_v17, 2 }
 0x112   : > { %v1055_v51 = vadd.f32 %v1039_v60, %v979_v33  ;;  %v896_v5 = vmul.f32 %v3034_v23, %v2785_v21  ;;  %v930_v27 = vrot.slane %v3034_v23, 1  ;;  %v751_v61 = vadd.f32 %v735_v44, %v675_v4 }
 0x113   : > { %v938_v62 = vrot.slane %v1803_v26, 1  ;;  %v674_v53 = vadd.f32 %v658_v6, %v589_v10  ;;  %v1006_v13 = vrot.slane %v3034_v23, 2  ;;  %v1014_v28 = vrot.slane %v1803_v26, 2 }
 0x114   : > { %v1070_v30 = vpack.c.bf16 %v1056_v55, %v1055_v51  ;;  %v3045_v60 = vsel %vm465_vm0, %v922_v35, %v930_v27  ;;  %v827_v33 = vadd.f32 %v811_v45, %v751_v61  ;;  %v427_v11 = vmul.f32 %v2761_v3, %v2707_v19 }
 0x115   : > { %v3050_v0 = vsel %vm465_vm0, %v930_v27, %v938_v62  ;;  %v971_v55 = vmul.f32 %v2799_v32, %v3045_v60  ;;  %v750_v6 = vadd.f32 %v734_v31, %v674_v53  ;;  %v3060_v38 = vsel %vm542_vm1, %v1006_v13, %v1014_v28 }
 0x116   : > { %1928 = vmatmul.mubr.bf16.vlgmr.msra.gmra.mrb[0].mxu0 %v1070_v30  ;;  %v972_v44 = vmul.f32 %v2799_v32, %v3050_v0  ;;  %v3064_v61 = vsel %vm542_vm1, %v998_v57, %v1006_v13  ;;  %v912_v62 = vadd.f32 %v896_v5, %v827_v33  ;;  %v1048_v51 = vmul.f32 %v2808_v40, %v3060_v38 }
 0x117   : > { %v1047_v45 = vmul.f32 %v2808_v40, %v3064_v61  ;;  %v428_v3 = vmul.f32 %v2770_v8, %v2707_v19  ;;  %v826_v53 = vadd.f32 %v810_v15, %v750_v6  ;;  %v490_v31 = vmul.f32 %v2804_v36, %v2710_v20 }
 0x118   : > { %v491_v4 = vmul.f32 %v2812_v41, %v2710_v20  ;;  %v567_v57 = vmul.f32 %v2827_v48, %v2716_v24  ;;  %v988_v26 = vadd.f32 %v972_v44, %v912_v62  ;;  %v568_v10 = vmul.f32 %v2823_v47, %v2716_v24 }
 0x119   : > { %v652_v5 = vmul.f32 %v2780_v18, %v2726_v39  ;;  %v653_v8 = vmul.f32 %v2975_v59, %v2726_v39  ;;  %v911_v15 = vadd.f32 %v895_v37, %v826_v53  ;;  %v506_v35 = vadd.f32 %v490_v31, %v427_v11 }
 0x11a   : > { %v507_v27 = vadd.f32 %v491_v4, %v428_v3  ;;  %v728_v36 = vmul.f32 %v2987_v34, %v2746_v56  ;;  %v1064_v41 = vadd.f32 %v1048_v51, %v988_v26  ;;  %v729_v48 = vmul.f32 %v2995_v52, %v2746_v56 }
 0x11b   : > { %v804_v30 = vmul.f32 %v3007_v50, %v2778_v12  ;;  %v805_v47 = vmul.f32 %v3001_v7, %v2778_v12  ;;  %v987_v13 = vadd.f32 %v971_v55, %v911_v15  ;;  %v583_v28 = vadd.f32 %v567_v57, %v506_v35 }
 0x11c   : > { %v584_v33 = vadd.f32 %v568_v10, %v507_v27  ;;  %v889_v37 = vmul.f32 %v2819_v46, %v2785_v21  ;;  %v890_v11 = vmul.f32 %v2829_v49, %v2785_v21  ;;  %v965_v6 = vmul.f32 %v2799_v32, %v2854_v25  ;;  %v1805_v27 = vld [vmem:[%s2676_s13] sm:$0xff]  }
 0x11d   : > { %v966_v44 = vmul.f32 %v2799_v32, %v2850_v22  ;;  %v1041_v62 = vmul.f32 %v2808_v40, %v2866_v14  ;;  %v1063_v51 = vadd.f32 %v1047_v45, %v987_v13  ;;  %v668_v55 = vadd.f32 %v652_v5, %v583_v28 }
 0x11e   : > { %v669_v3 = vadd.f32 %v653_v8, %v584_v33  ;;  %v1042_v53 = vmul.f32 %v2808_v40, %v2862_v29  ;;  %v435_v31 = vmul.f32 %v2885_v54, %v2707_v19  ;;  %v436_v4 = vmul.f32 %v2908_v9, %v2707_v19 }
 0x11f   : > { %v498_v57 = vmul.f32 %v2926_v43, %v2710_v20  ;;  %v499_v26 = vmul.f32 %v2922_v42, %v2710_v20  ;;  %v1074_v45 = vpack.c.bf16 %v1064_v41, %v1063_v51  ;;  %v744_v10 = vadd.f32 %v728_v36, %v668_v55  ;;  %v3124_v41 = vld [vmem:[%s2676_s13 + $0x8] sm:$0xff]  }
 0x120   : > { %v745_v5 = vadd.f32 %v729_v48, %v669_v3  ;;  %v575_v8 = vmul.f32 %v2942_v1, %v2716_v24  ;;  %v576_v54 = vmul.f32 %v2938_v63, %v2716_v24  ;;  %v660_v9 = vmul.f32 %v2910_v17, %v2726_v39 }
 0x121   : > { %v514_v15 = vadd.f32 %v498_v57, %v435_v31  ;;  %v515_v35 = vadd.f32 %v499_v26, %v436_v4  ;;  %1936 = vmatmul.mubr.bf16.vlgmr.msra.gmra.mrb[0].mxu1 %v1074_v45  ;;  %v820_v43 = vadd.f32 %v804_v30, %v744_v10  ;;  %v661_v42 = vmul.f32 %v3034_v23, %v2726_v39 }
 0x122   : > { %v821_v13 = vadd.f32 %v805_v47, %v745_v5  ;;  %v736_v36 = vmul.f32 %v3045_v60, %v2746_v56  ;;  %v737_v63 = vmul.f32 %v3050_v0, %v2746_v56  ;;  %v812_v28 = vmul.f32 %v3064_v61, %v2778_v12 }
 0x123   : > { %v591_v1 = vadd.f32 %v575_v8, %v514_v15  ;;  %v592_v48 = vadd.f32 %v576_v54, %v515_v35  ;;  %v905_v33 = vadd.f32 %v889_v37, %v820_v43  ;;  %v813_v30 = vmul.f32 %v3060_v38, %v2778_v12 }
 0x124   : > { %v906_v51 = vadd.f32 %v890_v11, %v821_v13  ;;  %v3132_v47 = vunpack.c.l.bf16 %v1805_v27  ;;  %v3134_v31 = vunpack.c.h.bf16 %v1805_v27  ;;  %v1810_v4 = vunpack.c.l.bf16 %v3124_v41 }
 0x125   : > { %v676_v55 = vadd.f32 %v660_v9, %v591_v1  ;;  %v677_v3 = vadd.f32 %v661_v42, %v592_v48  ;;  %v981_v57 = vadd.f32 %v965_v6, %v905_v33 }
 0x126   : > { %v982_v26 = vadd.f32 %v966_v44, %v906_v51  ;;  %v897_v45 = vmul.f32 %v3132_v47, %v2785_v21  ;;  %v923_v10 = vrot.slane %v3132_v47, 1  ;;  %v898_v5 = vmul.f32 %v3134_v31, %v2785_v21 }
 0x127   : > { %v752_v37 = vadd.f32 %v736_v36, %v676_v55  ;;  %v753_v11 = vadd.f32 %v737_v63, %v677_v3  ;;  %v3143_v8 = vrot.slane %v3134_v31, 1  ;;  %v1057_v15 = vadd.f32 %v1041_v62, %v981_v57 }
 0x128   : > { %v1058_v35 = vadd.f32 %v1042_v53, %v982_v26  ;;  %v939_v54 = vrot.slane %v1810_v4, 1  ;;  %v999_v9 = vrot.slane %v3132_v47, 2  ;;  %v3150_v43 = vrot.slane %v3134_v31, 2 }
 0x129   : > { %v828_v6 = vadd.f32 %v812_v28, %v752_v37  ;;  %v829_v44 = vadd.f32 %v813_v30, %v753_v11  ;;  %v955_v27 = vsel %vm465_vm0, %v923_v10, %v3143_v8  ;;  %v1015_v53 = vrot.slane %v1810_v4, 2 }
 0x12a   : > { %v1071_v13 = vpack.c.bf16 %v1058_v35, %v1057_v15  ;;  %v947_v42 = vsel %vm465_vm0, %v3143_v8, %v939_v54  ;;  %v973_v62 = vmul.f32 %v2799_v32, %v955_v27  ;;  %v1031_v63 = vsel %vm542_vm1, %v999_v9, %v3150_v43 }
 0x12b   : > { %v913_v36 = vadd.f32 %v897_v45, %v828_v6  ;;  %v914_v1 = vadd.f32 %v898_v5, %v829_v44  ;;  %v974_v48 = vmul.f32 %v2799_v32, %v947_v42  ;;  %v1023_v28 = vsel %vm542_vm1, %v3150_v43, %v1015_v53  ;;  %v3414_v6 = vld [vmem:[#allocation26_spill] sm:$0xff]  ;;  %v3415_v44 = vld [vmem:[#allocation27_spill] sm:$0xff]  ;;  %v3416_v42 = vld [vmem:[#allocation29_spill] sm:$0xff] }
 0x12c   : > { %1931 = vmatprep.mubr.bf16.mxu0 %v1071_v13  ;;  %v1049_v33 = vmul.f32 %v2808_v40, %v1031_v63  ;;  %v429_v51 = vmul.f32 %v2780_v18, %v2707_v19  ;;  %v430_v30 = vmul.f32 %v2975_v59, %v2707_v19  ;;  %v1050_v4 = vmul.f32 %v2808_v40, %v1023_v28  ;;  %v619_v13 = vld [vmem:[%s2676_s13 + $0x8] sm:$0xf] }
 0x12d   : > { %v989_v55 = vadd.f32 %v973_v62, %v913_v36  ;;  %v990_v3 = vadd.f32 %v974_v48, %v914_v1  ;;  %v492_v57 = vmul.f32 %v2987_v34, %v2710_v20  ;;  %v493_v26 = vmul.f32 %v2995_v52, %v2710_v20 }
 0x12e   : > { %v569_v45 = vmul.f32 %v3007_v50, %v2716_v24  ;;  %v570_v10 = vmul.f32 %v3001_v7, %v2716_v24  ;;  %v654_v18 = vmul.f32 %v2819_v46, %v2726_v39  ;;  %v655_v5 = vmul.f32 %v2829_v49, %v2726_v39 }
 0x12f   : > { %v1065_v59 = vadd.f32 %v1049_v33, %v989_v55  ;;  %v1066_v37 = vadd.f32 %v1050_v4, %v990_v3  ;;  %v508_v11 = vadd.f32 %v492_v57, %v429_v51  ;;  %v509_v34 = vadd.f32 %v493_v26, %v430_v30 }
 0x130   : > { %v730_v52 = vmul.f32 %v2746_v56, %v2854_v25  ;;  %v731_v50 = vmul.f32 %v2746_v56, %v2850_v22  ;;  %v806_v7 = vmul.f32 %v2778_v12, %v2866_v14  ;;  %v807_v46 = vmul.f32 %v2778_v12, %v2862_v29  ;;  %v3417_v29 = vld [vmem:[#allocation28_spill] sm:$0xff] }
 0x131   : > { %v1075_v15 = vpack.c.bf16 %v1066_v37, %v1065_v59  ;;  %v585_v35 = vadd.f32 %v569_v45, %v508_v11  ;;  %v891_v54 = vmul.f32 %v2836_v58, %v2785_v21  ;;  %v586_v9 = vadd.f32 %v570_v10, %v509_v34  ;;  %v1887_v45 = vld [vmem:[%s2676_s13 + $0x10] sm:$0xff]   ;;  %s2220_s13 = sshll.u32 %s2366_s16, 4  ;;  %s2221_s13 = int_to_ptr.vmem [resolvable:$false] %s2220_s13 }
 0x132   : > { %v892_v49 = vmul.f32 %v2846_v16, %v2785_v21  ;;  %v967_v25 = vmul.f32 %v2799_v32, %v3414_v6  ;;  %v968_v22 = vmul.f32 %v2799_v32, %v3415_v44  ;;  %v1043_v62 = vmul.f32 %v2808_v40, %v3416_v42  ;;  %s2222_s29 = scalar_lea.vmem %s2221_s13, 2048  ;;  %p2223_p5 = scmp.lt.s32.totalorder %s3282_s11, %s2221_s13 }
 0x133   : > { %1939 = vmatprep.mubr.bf16.mxu1 %v1075_v15  ;;  %v670_v14 = vadd.f32 %v654_v18, %v585_v35  ;;  %v1044_v53 = vmul.f32 %v2808_v40, %v3417_v29  ;;  %v437_v58 = vmul.f32 %v2910_v17, %v2707_v19  ;;  %v671_v36 = vadd.f32 %v655_v5, %v586_v9  ;;  %p2224_p8 = scmp.lt.s32.totalorder %s2222_s29, %s2216_s18 }
 0x134   : > { %v438_v16 = vmul.f32 %v3034_v23, %v2707_v19  ;;  %v500_v1 = vmul.f32 %v3045_v60, %v2710_v20  ;;  %v501_v48 = vmul.f32 %v3050_v0, %v2710_v20  ;;  %v577_v33 = vmul.f32 %v3064_v61, %v2716_v24 }
 0x135   : > { %v746_v28 = vadd.f32 %v730_v52, %v670_v14  ;;  %v578_v51 = vmul.f32 %v3060_v38, %v2716_v24  ;;  %v643_v30 = vunpack.c.l.bf16 %v619_v13  ;;  %v747_v17 = vadd.f32 %v731_v50, %v671_v36  ;;  %p2225_p6 = por %p2224_p8, %p2223_p5 }
 0x136   : > { %v516_v55 = vadd.f32 %v500_v1, %v437_v58  ;;  %v517_v3 = vadd.f32 %v501_v48, %v438_v16  ;;  %v662_v19 = vmul.f32 %v3132_v47, %v2726_v39  ;;  %v663_v60 = vmul.f32 %v3134_v31, %v2726_v39 }
 0x137   : > { %v822_v23 = vadd.f32 %v806_v7, %v746_v28  ;;  %v703_v20 = vrot.slane %v643_v30, 1  ;;  %v738_v0 = vmul.f32 %v955_v27, %v2746_v56  ;;  %v823_v4 = vadd.f32 %v807_v46, %v747_v17  ;;  %v3247_v28 = vld [vmem:[%s3418_s21] ss:$0 sm:$0xff]  ;;  %p2226_p3 = pnand %p2225_p6, %p2219_p4 }
 0x138   : > { %v593_v57 = vadd.f32 %v577_v33, %v516_v55  ;;  %v594_v61 = vadd.f32 %v578_v51, %v517_v3  ;;  %v779_v26 = vrot.slane %v643_v30, 2  ;;  %v814_v10 = vmul.f32 %v1031_v63, %v2778_v12 }
 0x139   : > { %v907_v24 = vadd.f32 %v891_v54, %v822_v23  ;;  %v711_v38 = vsel %vm465_vm0, %v3143_v8, %v703_v20  ;;  %v1811_v47 = vunpack.c.h.bf16 %v3124_v41  ;;  %v908_v18 = vadd.f32 %v892_v49, %v823_v4 }
 0x13a   : > { %v678_v59 = vadd.f32 %v662_v19, %v593_v57  ;;  %v679_v39 = vadd.f32 %v663_v60, %v594_v61  ;;  %v739_v31 = vmul.f32 %v2746_v56, %v711_v38  ;;  %v787_v37 = vsel %vm542_vm1, %v3150_v43, %v779_v26 }
 0x13b   : > { %v983_v27 = vadd.f32 %v967_v25, %v907_v24  ;;  %v1814_v11 = vunpack.c.l.bf16 %v1887_v45  ;;  %v1815_v5 = vunpack.c.h.bf16 %v1887_v45  ;;  %v984_v34 = vadd.f32 %v968_v22, %v908_v18 }
 0x13c   : > { %v754_v52 = vadd.f32 %v738_v0, %v678_v59  ;;  %v755_v50 = vadd.f32 %v739_v31, %v679_v39  ;;  %v815_v8 = vmul.f32 %v2778_v12, %v787_v37  ;;  %v899_v41 = vmul.f32 %v1811_v47, %v2785_v21 }
 0x13d   : > { %v1059_v63 = vadd.f32 %v1043_v62, %v983_v27  ;;  %v900_v7 = vmul.f32 %v1814_v11, %v2785_v21  ;;  %v924_v15 = vrot.slane %v1811_v47, 1  ;;  %v1060_v35 = vadd.f32 %v1044_v53, %v984_v34 }
 0x13e   : > { %v830_v56 = vadd.f32 %v814_v10, %v754_v52  ;;  %v831_v46 = vadd.f32 %v815_v8, %v755_v50  ;;  %v932_v54 = vrot.slane %v1814_v11, 1  ;;  %v940_v9 = vrot.slane %v1815_v5, 1 }
 0x13f   : > { %v1000_v49 = vrot.slane %v1811_v47, 2  ;;  %v1008_v43 = vrot.slane %v1814_v11, 2  ;;  %v1016_v6 = vrot.slane %v1815_v5, 2  ;;  %v1072_v25 = vpack.c.bf16 %v1060_v35, %v1059_v63 }
 0x140   : > { %v915_v44 = vadd.f32 %v899_v41, %v830_v56  ;;  %v916_v22 = vadd.f32 %v900_v7, %v831_v46  ;;  %v956_v12 = vsel %vm465_vm0, %v924_v15, %v932_v54  ;;  %v948_v13 = vsel %vm465_vm0, %v932_v54, %v940_v9 }
 0x141   : > { %v975_v21 = vmul.f32 %v2799_v32, %v956_v12  ;;  %v1024_v14 = vsel %vm542_vm1, %v1008_v43, %v1016_v6  ;;  %v1032_v42 = vsel %vm542_vm1, %v1000_v49, %v1008_v43  ;;  %1932 = vmatmul.mubr.bf16.gmra.mrb[4].mxu0 %v1072_v25  ;;  %v976_v62 = vmul.f32 %v2799_v32, %v948_v13 }
 0x142   : > { %v1051_v29 = vmul.f32 %v2808_v40, %v1032_v42  ;;  %v1052_v53 = vmul.f32 %v2808_v40, %v1024_v14 }
 0x143   : > { %v991_v58 = vadd.f32 %v975_v21, %v915_v44  ;;  %v992_v36 = vadd.f32 %v976_v62, %v916_v22 }
 0x145   : > { %v1067_v16 = vadd.f32 %v1051_v29, %v991_v58  ;;  %v1068_v1 = vadd.f32 %v1052_v53, %v992_v36 }
 0x147   : > { %v1076_v48 = vpack.c.bf16 %v1068_v1, %v1067_v16 }
 0x149   : > { %1940 = vmatmul.mubr.bf16.gmra.mrb[4].mxu1 %v1076_v48 }
 0x1e9   : > { %v1929_v2 = vpop.f32.mrb[0].mxu0 }
 0x1ea   : > { %v1191_v33 = vadd.f32 %v1929_v2, %v3247_v28  ;;  %v1182_v51 = vpop.f32.mrb[1].mxu0 }
 0x1eb   : > { %v1183_v32 = vadd.f32 %v3247_v28, %v1182_v51  ;;  %v1930_v30 = vpop.f32.mrb[2].mxu0 }
 0x1ec   : > { %v1247_v17 = vadd.f32 3.0, %v1191_v33  ;;  %v1194_v40 = vadd.f32 %v1930_v30, %v3247_v28  ;;  %v1185_v55 = vpop.f32.mrb[3].mxu0 }
 0x1ed   : > { %v1245_v3 = vadd.f32 3.0, %v1183_v32  ;;  %v1186_v19 = vadd.f32 %v3247_v28, %v1185_v55 }
 0x1ee   : > { %v1263_v23 = vmax.f32 %v1247_v17, 0.0  ;;  %v1248_v60 = vadd.f32 3.0, %v1194_v40 }
 0x1ef   : > { %v1261_v20 = vmax.f32 %v1245_v3, 0.0  ;;  %v1246_v0 = vadd.f32 3.0, %v1186_v19 }
 0x1f0   : > { %v1279_v4 = vmin.f32 %v1263_v23, 6.0  ;;  %v1264_v57 = vmax.f32 %v1248_v60, 0.0 }
 0x1f1   : > { %v1277_v61 = vmin.f32 %v1261_v20, 6.0  ;;  %v1262_v26 = vmax.f32 %v1246_v0, 0.0 }
 0x1f2   : > { %v1295_v45 = vmul.f32 %v1279_v4, %v1191_v33  ;;  %v1280_v24 = vmin.f32 %v1264_v57, 6.0 }
 0x1f3   : > { %v1293_v38 = vmul.f32 %v1277_v61, %v1183_v32  ;;  %v1278_v10 = vmin.f32 %v1262_v26, 6.0 }
 0x1f4   : > { %v1296_v47 = vmul.f32 %v1280_v24, %v1194_v40  ;;  %v1311_v59 = vmul.f32 0.16666667, %v1295_v45  ;;  %v1937_v39 = vpop.f32.mrb[0].mxu1 }
 0x1f5   : > { %v1294_v18 = vmul.f32 %v1278_v10, %v1186_v19  ;;  %v1223_v27 = vadd.f32 %v1937_v39, %v3247_v28  ;;  %v1309_v37 = vmul.f32 0.16666667, %v1293_v38  ;;  %v1214_v11 = vpop.f32.mrb[1].mxu1 }
 0x1f6   : > { %v1312_v31 = vmul.f32 0.16666667, %v1296_v47  ;;  %v1215_v34 = vadd.f32 %v3247_v28, %v1214_v11  ;;  %v1938_v50 = vpop.f32.mrb[2].mxu1 }
 0x1f7   : > { %v1310_v5 = vmul.f32 0.16666667, %v1294_v18  ;;  %v1255_v8 = vadd.f32 3.0, %v1223_v27  ;;  %v1226_v63 = vadd.f32 %v1938_v50, %v3247_v28  ;;  %v1217_v7 = vpop.f32.mrb[3].mxu1 }
 0x1f8   : > { %v1824_v52 = vpack.c.bf16 %v1312_v31, %v1311_v59  ;;  %v1253_v15 = vadd.f32 3.0, %v1215_v34  ;;  %v1218_v35 = vadd.f32 %v3247_v28, %v1217_v7 }
 0x1f9   : > { %v1819_v41 = vpack.c.bf16 %v1310_v5, %v1309_v37  ;;  %v1271_v56 = vmax.f32 %v1255_v8, 0.0  ;;  %v1256_v46 = vadd.f32 3.0, %v1226_v63 }
 0x1fa   : > { %1888 = vst [vmem:[%s3257_s3 + $0x8] sm:$0xff] %v1824_v52   ;;  %v1269_v54 = vmax.f32 %v1253_v15, 0.0  ;;  %v1254_v9 = vadd.f32 3.0, %v1218_v35 }
 0x1fb   : > { %1820 = vst [vmem:[%s3257_s3] sm:$0xff] %v1819_v41   ;;  %v1287_v49 = vmin.f32 %v1271_v56, 6.0  ;;  %v1272_v43 = vmax.f32 %v1256_v46, 0.0 }
 0x1fc   : > { %v1285_v6 = vmin.f32 %v1269_v54, 6.0  ;;  %v1270_v25 = vmax.f32 %v1254_v9, 0.0 }
 0x1fd   : > { %v1303_v44 = vmul.f32 %v1287_v49, %v1223_v27  ;;  %v1288_v22 = vmin.f32 %v1272_v43, 6.0 }
 0x1fe   : > { %v1301_v12 = vmul.f32 %v1285_v6, %v1215_v34  ;;  %v1286_v13 = vmin.f32 %v1270_v25, 6.0 }
 0x1ff   : > { %v1304_v21 = vmul.f32 %v1288_v22, %v1226_v63  ;;  %v1319_v42 = vmul.f32 0.16666667, %v1303_v44 }
 0x200   : > { %v1302_v14 = vmul.f32 %v1286_v13, %v1218_v35  ;;  %v1317_v29 = vmul.f32 0.16666667, %v1301_v12 }
 0x201   : > { %v1320_v62 = vmul.f32 0.16666667, %v1304_v21 }
 0x202   : > { %v1318_v53 = vmul.f32 0.16666667, %v1302_v14 }
 0x203   : > { %v1844_v58 = vpack.c.bf16 %v1320_v62, %v1319_v42 }
 0x204   : > { %v1839_v36 = vpack.c.bf16 %v1318_v53, %v1317_v29 }
 0x205   : > { %1892 = vst [vmem:[%s3257_s3 + $0x28] sm:$0xff] %v1844_v58  }
 0x206   : > { %1891 = vst [vmem:[%s3257_s3 + $0x20] sm:$0xff] %v1839_v36  }
 0x214   : > { %v1933_v16 = vpop.f32.mrb[4].mxu0 }
 0x215   : > { %v1207_v1 = vadd.f32 %v1933_v16, %v3247_v28  ;;  %v1198_v48 = vpop.f32.mrb[5].mxu0 }
 0x216   : > { %v1199_v2 = vadd.f32 %v3247_v28, %v1198_v48  ;;  %v1934_v33 = vpop.f32.mrb[6].mxu0 }
 0x217   : > { %v1251_v51 = vadd.f32 3.0, %v1207_v1  ;;  %v1210_v32 = vadd.f32 %v1934_v33, %v3247_v28  ;;  %v1201_v30 = vpop.f32.mrb[7].mxu0 }
 0x218   : > { %v1249_v17 = vadd.f32 3.0, %v1199_v2  ;;  %v1202_v40 = vadd.f32 %v3247_v28, %v1201_v30 }
 0x219   : > { %v1267_v55 = vmax.f32 %v1251_v51, 0.0  ;;  %v1252_v3 = vadd.f32 3.0, %v1210_v32 }
 0x21a   : > { %v1265_v19 = vmax.f32 %v1249_v17, 0.0  ;;  %v1250_v23 = vadd.f32 3.0, %v1202_v40 }
 0x21b   : > { %v1283_v60 = vmin.f32 %v1267_v55, 6.0  ;;  %v1268_v20 = vmax.f32 %v1252_v3, 0.0 }
 0x21c   : > { %v1941_v0 = vpop.f32.mrb[4].mxu1  ;;  %v1281_v4 = vmin.f32 %v1265_v19, 6.0  ;;  %v1266_v57 = vmax.f32 %v1250_v23, 0.0 }
 0x21d   : > { %v1299_v61 = vmul.f32 %v1283_v60, %v1207_v1  ;;  %v1239_v26 = vadd.f32 %v1941_v0, %v3247_v28  ;;  %v1230_v45 = vpop.f32.mrb[5].mxu1  ;;  %v1284_v24 = vmin.f32 %v1268_v20, 6.0 }
 0x21e   : > { %v1297_v38 = vmul.f32 %v1281_v4, %v1199_v2  ;;  %v1231_v10 = vadd.f32 %v3247_v28, %v1230_v45  ;;  %v1942_v47 = vpop.f32.mrb[6].mxu1  ;;  %v1282_v18 = vmin.f32 %v1266_v57, 6.0 }
 0x21f   : > { %v1259_v59 = vadd.f32 3.0, %v1239_v26  ;;  %v1300_v39 = vmul.f32 %v1284_v24, %v1210_v32  ;;  %v1242_v31 = vadd.f32 %v1942_v47, %v3247_v28  ;;  %v1233_v27 = vpop.f32.mrb[7].mxu1  ;;  %v1315_v34 = vmul.f32 0.16666667, %v1299_v61 }
 0x220   : > { %v1257_v37 = vadd.f32 3.0, %v1231_v10  ;;  %v1298_v11 = vmul.f32 %v1282_v18, %v1202_v40  ;;  %v1234_v5 = vadd.f32 %v3247_v28, %v1233_v27  ;;  %v1313_v63 = vmul.f32 0.16666667, %v1297_v38 }
 0x221   : > { %v1275_v52 = vmax.f32 %v1259_v59, 0.0  ;;  %v1316_v50 = vmul.f32 0.16666667, %v1300_v39  ;;  %v1260_v8 = vadd.f32 3.0, %v1242_v31 }
 0x222   : > { %v1273_v41 = vmax.f32 %v1257_v37, 0.0  ;;  %v1314_v7 = vmul.f32 0.16666667, %v1298_v11  ;;  %v1258_v15 = vadd.f32 3.0, %v1234_v5 }
 0x223   : > { %v1291_v35 = vmin.f32 %v1275_v52, 6.0  ;;  %v1834_v56 = vpack.c.bf16 %v1316_v50, %v1315_v34  ;;  %v1276_v46 = vmax.f32 %v1260_v8, 0.0 }
 0x224   : > { %v1289_v54 = vmin.f32 %v1273_v41, 6.0  ;;  %v1829_v9 = vpack.c.bf16 %v1314_v7, %v1313_v63  ;;  %v1274_v49 = vmax.f32 %v1258_v15, 0.0 }
 0x225   : > { %v1307_v28 = vmul.f32 %v1291_v35, %v1239_v26  ;;  %1890 = vst [vmem:[%s3257_s3 + $0x18] sm:$0xff] %v1834_v56   ;;  %v1292_v43 = vmin.f32 %v1276_v46, 6.0 }
 0x226   : > { %v1305_v6 = vmul.f32 %v1289_v54, %v1231_v10  ;;  %1889 = vst [vmem:[%s3257_s3 + $0x10] sm:$0xff] %v1829_v9   ;;  %v1290_v25 = vmin.f32 %v1274_v49, 6.0 }
 0x227   : > { %v1308_v44 = vmul.f32 %v1292_v43, %v1242_v31  ;;  %v1323_v12 = vmul.f32 0.16666667, %v1307_v28 }
 0x228   : > { %v1306_v22 = vmul.f32 %v1290_v25, %v1234_v5  ;;  %v1321_v21 = vmul.f32 0.16666667, %v1305_v6 }
 0x229   : > { %v1324_v13 = vmul.f32 0.16666667, %v1308_v44 }
 0x22a   : > { %v1322_v14 = vmul.f32 0.16666667, %v1306_v22 }
 0x22b   : > { %v1854_v42 = vpack.c.bf16 %v1324_v13, %v1323_v12 }
 0x22c   : > { %v1849_v62 = vpack.c.bf16 %v1322_v14, %v1321_v21 }
 0x22d   : > { %1894 = vst [vmem:[%s3257_s3 + $0x38] sm:$0xff] %v1854_v42  }
 0x22e   : > { %1893 = vst [vmem:[%s3257_s3 + $0x30] sm:$0xff] %v1849_v62  }
 0x22f   : > { %2229 = shalt.err (!%p2226_p3)
}
 0x230   : > { %s2230_s12 = scalar_lea.hbm %s3280_s17, 1024  ;;  %s2234_s3 = scalar_lea.hbm %s3422_s9, 4096 }
 0x231   : > { %p2231_p7 = scmp.ne.s32.totalorder %s3280_s17, %s2230_s12  ;;  %p2235_p0 = scmp.lt.u32.totalorder %s3280_s17, %s3422_s9 }
 0x232   : > { %p2236_p10 = scmp.lt.u32.totalorder %s2234_s3, %s2230_s12  ;;  %p2238_p11 = scmp.lt.u32.totalorder %s2230_s12, %s3280_s17 }
 0x233   : > { %p2232_p2 = pnand %p2231_p7, %p3423_p12 }
 0x234   : > { %p2237_p9 = por %p2236_p10, %p2235_p0 }
 0x235   : > { %p2233_p13 = pneg %p2232_p2 }
 0x236   : > { %p2239_p1 = por %p2238_p11, %p2237_p9 }
 0x238   : > { %p2240_p4 = pnand %p2239_p1, %p2233_p13 }
 0x23a   : > { %2243 = shalt.err (!%p2240_p4)
}
 0x23b   : > { %s2367_s14 = smov 64   ;;  %s2368_s4 = smov 4  }
 0x23c   : > { %1978 = dma.vmem_to_hbm [thread:$0]  (%p3423_p12), %s3282_s11, 1024, %s3280_s17, %s1406_s5, %s2367_s14, %s2367_s14, %s2368_s4  }
 0x23d PF: > { %s3424_s24 = sld [smem:[#allocation16_spill]]  ;;  %s3425_s30 = sld [smem:[#allocation24_spill]] }
 0x23e   : > { %p1995_p5 = scmp.ge.s32.totalorder %s2352_s28, 2 }
 0x243   : > { %s1437_s7 = sand.u32 1, %s3424_s24   ;;  %p3426_p8 = scmp.ne.s32.totalorder %s3425_s30, 0 }
 0x244   : > { %s1438_s10 = scalar_lea.sflag [#allocation4], %s1437_s7 }
 0x245   : > { %p1988_p6 = pnand %p1995_p5, %p3426_p8 }
 0x247   : > { %2305 = dma.done.wait (!%p1988_p6), %s1438_s10, 1024  }
 0x248   : > { %2307 = vsyncadd (!%p1988_p6), %s1438_s10, 4294966272  ;;  %s25_s28 = sadd.s32 1, %s2352_s28   ;;  %s3427_s16 = sld [smem:[#allocation25_spill]] }
 0x249   : > { %p22_p3 = scmp.ge.s32.totalorder %s25_s28, 6   ;;  %s3428_s6 = sld [smem:[#allocation21_spill]] }
 0x24a   : > { %s3429_s15 = sld [smem:[#allocation19_spill]]  ;;  %s3430_s11 = sld [smem:[#allocation20_spill]] }
 0x24b   : > { %s3431_s18 = smov %s2316_s19  ;;  %s3432_s19 = smov %s2320_s20 }
 0x24c   : > { %s3434_s21 = smov %s2328_s22  ;;  %s3435_s22 = smov %s2332_s23 }
 0x24d   : > { %s3437_s24 = smov %s2344_s26  ;;  %s3438_s25 = smov %s2348_s27 }
 0x24e   : > { %s3433_s20 = smov %s3427_s16  ;;  %24 = sbr.rel (!%p22_p3) target bundleno = 17 (0x11), region = 108 }
 0x24f   : > { %s3436_s23 = smov %s3428_s6 }
 0x250   : > { %s3439_s26 = smov %s3429_s15  ;;  %s3440_s27 = smov %s3430_s11 }
 0x255   :  { %1443 = vsyncpa [#allocation3], 1 }
 0x256   :  { %1445 = vsyncpa [#allocation3 + $0x1], 1 }
 0x257   :  { %1446 = vsyncpa [#allocation6], 1 }
 0x258   :  { %1448 = vsyncpa [#allocation6 + $0x1], 1 }
 0x259   :  { %1449 = vsyncpa [#allocation9], 1 }
 0x25a   :  { %1450 = vsyncpa [#allocation4], 1 }
 0x25b   :  { %1452 = vsyncpa [#allocation4 + $0x1], 1 }

</bundles_post_ra>
